<compile_context>
chip_gen: v7x
topology: tpu7x:2x2x1
jax: 0.10.0
libtpu: 0.0.40
codegen_flags: <defaults>
</compile_context>

<pallas_src>
import functools

import jax
import jax.numpy as jnp
from jax.experimental import pallas as pl
from jax.experimental.pallas import tpu as pltpu

KSIZE = 5                      # (1, 5) conv kernels, padding='same'
PAD = (KSIZE - 1) // 2


def _elu(x):
    # ELU(alpha=1): x if x > 0 else exp(x) - 1   (EUP exp, VPU select)
    return jnp.where(x > 0, x, jnp.exp(jnp.minimum(x, 0.0)) - 1.0)


# --------------------------------- kernel ----------------------------------

def model3_kernel(
    x_ref,                                # (Bt, H, W, Tin) f32 — one batch tile
    w1_ref, b1_ref, s1_ref, t1_ref,       # conv1 (5*Tin, c1) bf16 ; bias / BN1 scale,shift f32
    wres_ref, bres_ref,                   # res1 1x1 conv (c1, c2) bf16 ; bias f32
    w2_ref, b2_ref,                       # conv2 (5*c1, c2) bf16 ; bias f32
    w3_ref, b3_ref,                       # conv3 grouped-1x1 as dense (c2, 2c2) bf16, BN2 folded ; bias f32
    wp1_ref, bp1_ref,                     # fc1 (2c2, h3) bf16, BN3 + 1/(H*W) pool folded ; bias f32
    wfc2_ref, bfc2_ref,                   # fc2 (h3, nc) bf16 ; bias f32
    out_ref,                              # (Bt, 1, nc) f32 log-probs
):
    Bt, H, W, Tin = x_ref.shape
    c1 = b1_ref.shape[-1]
    BH = Bt * H
    M = BH * W

    def im2col(v3, cin):
        # v3: (BH, W, cin) -> (M, KSIZE*cin), zero 'same' padding along W.
        z = jnp.zeros((BH, PAD, cin), v3.dtype)
        vp = jnp.concatenate([z, v3, z], axis=1)                 # (BH, W+4, cin)
        cols = [vp[:, k:k + W, :] for k in range(KSIZE)]         # static slices
        return jnp.concatenate(cols, axis=-1).reshape(M, KSIZE * cin)

    def mm(a, w_ref):
        # single MXU push, bf16 operands, f32 accumulation
        return jnp.dot(a.astype(jnp.bfloat16), w_ref[...],
                       preferred_element_type=jnp.float32)

    x = x_ref[...].reshape(BH, W, Tin)

    # ---- conv1 (1,5) 'same': one fused matmul -------------------------------
    h1 = mm(im2col(x, Tin), w1_ref) + b1_ref[...]                # (M, c1)
    # ELU -> BN1 (kept explicit: feeds both the residual conv and conv2)
    e1 = _elu(h1) * s1_ref[...] + t1_ref[...]

    # ---- residual 1x1 conv ---------------------------------------------------
    res = mm(e1, wres_ref) + bres_ref[...]                       # (M, c2)

    # ---- conv2 (1,5) 'same': one fused matmul --------------------------------
    h2 = mm(im2col(e1.reshape(BH, W, c1), c1), w2_ref) + b2_ref[...]
    e2 = _elu(h2 + res)                                          # (M, c2)
    # (BN2 scale/shift folded into w3/b3 in the wrapper)

    # ---- conv3 grouped 1x1 (dense sparse-pattern matmul, BN2 pre-folded) -----
    e3 = _elu(mm(e2, w3_ref) + b3_ref[...])                      # (M, 2*c2)
    # (BN3 and the 1/(H*W) adaptive-avg-pool factor folded into fc1)

    # ---- adaptive avg pool (1,1): per-batch spatial sum ----------------------
    pooled = jnp.sum(e3.reshape(Bt, H * W, e3.shape[-1]), axis=1)   # (Bt, 2*c2)

    # ---- fc1 -> ELU -> (dropout = identity at inference) -> fc2 --------------
    # TODO(synk): training-mode dropout would need pltpu.prng_seed/prng_random_bits.
    f1 = _elu(mm(pooled, wp1_ref) + bp1_ref[...])                # (Bt, h3)
    z = mm(f1, wfc2_ref) + bfc2_ref[...]                         # (Bt, nc)

    # ---- log_softmax ----------------------------------------------------------
    z = z - jnp.max(z, axis=-1, keepdims=True)
    z = z - jnp.log(jnp.sum(jnp.exp(z), axis=-1, keepdims=True))
    out_ref[...] = z.reshape(out_ref.shape)


# --------------------------------- wrapper ---------------------------------

def model3_forward(x_nchw, params, *, num_classes):
    """x_nchw: (B, T, H, W) float32, PyTorch layout."""
    B, Tin, H, W = x_nchw.shape
    c1 = params["b1"].shape[-1]
    c2 = params["bres"].shape[-1]
    bf16 = jnp.bfloat16

    # NCHW -> channels-last; 'same' padding happens inside the kernel.
    x = jnp.transpose(x_nchw, (0, 2, 3, 1)).astype(jnp.float32)   # (B, H, W, Tin)

    # Flatten (1,5) conv taps for the fused im2col matmuls.
    w1 = params["w1"].reshape(KSIZE * Tin, c1).astype(bf16)
    w2 = params["w2"].reshape(KSIZE * c1, c2).astype(bf16)
    wres = params["wres"].astype(bf16)

    # Fold BN2 (s2, t2) into the conv3 1x1 matmul.
    w3 = (params["s2"].reshape(c2, 1) * params["w3d"]).astype(bf16)
    b3 = params["t2"] @ params["w3d"] + params["b3"]

    # Fold BN3 (s3, t3) and the 1/(H*W) pooling factor into fc1.
    wp1 = ((params["s3"].reshape(-1, 1) / float(H * W)) * params["wfc1"]).astype(bf16)
    bp1 = params["t3"] @ params["wfc1"] + params["bfc1"]

    wfc2 = params["wfc2"].astype(bf16)

    weights = (w1, params["b1"], params["s1"], params["t1"],
               wres, params["bres"],
               w2, params["b2"],
               w3, b3,
               wp1, bp1,
               wfc2, params["bfc2"])

    # Batch tile: biggest divisor of B keeping the matmul M dim (Bt*H*W) modest.
    bt = 1
    for d in range(1, B + 1):
        if B % d == 0 and d * H * W <= 1024:
            bt = d
    grid = (B // bt,)

    def wspec(a):
        nd = a.ndim
        return pl.BlockSpec(a.shape, lambda g, _nd=nd: (0,) * _nd)

    out = pl.pallas_call(
        model3_kernel,
        out_shape=jax.ShapeDtypeStruct((B, 1, num_classes), jnp.float32),
        grid=grid,
        in_specs=[pl.BlockSpec((bt, H, W, Tin), lambda g: (g, 0, 0, 0))]
                 + [wspec(a) for a in weights],
        out_specs=pl.BlockSpec((bt, 1, num_classes), lambda g: (g, 0, 0)),
        compiler_params=pltpu.CompilerParams(
            dimension_semantics=("parallel",)),
    )(x, *weights)

    return out[:, 0, :]


# --------------------------- pure-JAX f32 reference -------------------------

def model3_ref(x_nchw, params):
    B, Tin, H, W = x_nchw.shape
    x = jnp.transpose(x_nchw, (0, 2, 3, 1)).astype(jnp.float32)   # (B, H, W, Tin)

    def conv1x5(v, taps, b):                 # taps: (5, cin, cout)
        vp = jnp.pad(v, ((0, 0), (0, 0), (PAD, PAD), (0, 0)))
        out = b
        for k in range(KSIZE):
            out = out + vp[:, :, k:k + W, :] @ taps[k]
        return out

    h = _elu(conv1x5(x, params["w1"], params["b1"])) * params["s1"] + params["t1"]
    res = h @ params["wres"] + params["bres"]
    h2 = conv1x5(h, params["w2"], params["b2"]) + res
    h2 = _elu(h2) * params["s2"] + params["t2"]
    h3 = _elu(h2 @ params["w3d"] + params["b3"]) * params["s3"] + params["t3"]
    pooled = jnp.mean(h3, axis=(1, 2))                            # (B, 2c2)
    f1 = _elu(pooled @ params["wfc1"] + params["bfc1"])
    z = f1 @ params["wfc2"] + params["bfc2"]
    return jax.nn.log_softmax(z, axis=-1)


# ------------------------- deterministic param init -------------------------

def init_params(key, *, tin, h1=16, h2=32, h3=100, num_classes=10):
    ks = jax.random.split(key, 24)
    n = lambda i, shape, s=0.1: s * jax.random.normal(ks[i], shape, jnp.float32)

    def bn_fold(kg, kb, km, kv, c):
        gamma = 1.0 + n(kg, (c,))
        beta = n(kb, (c,))
        mean = n(km, (c,))
        var = 1.0 + 0.05 * jnp.abs(jax.random.normal(ks[kv], (c,), jnp.float32))
        scale = gamma / jnp.sqrt(var + 1e-5)
        shift = beta - mean * scale
        return scale.reshape(1, c), shift.reshape(1, c)

    # conv1: torch weight (h1, tin, 1, 5) -> taps (5, tin, h1)
    w1 = n(0, (5, tin, h1))
    b1 = n(1, (1, h1))
    s1, t1 = bn_fold(2, 3, 4, 5, h1)

    # res1: 1x1 conv (h2, h1, 1, 1) -> (h1, h2)
    wres = n(6, (h1, h2))
    bres = n(7, (1, h2))

    # conv2: (h2, h1, 1, 5) -> taps (5, h1, h2)
    w2 = n(8, (5, h1, h2))
    b2 = n(9, (1, h2))
    s2, t2 = bn_fold(10, 11, 12, 13, h2)

    # conv3: grouped 1x1, groups=h2, out=2*h2 -> dense (h2, 2*h2) with
    # W3d[o // 2, o] = w3[o] (each output channel reads its single group input).
    c3 = 2 * h2
    w3 = n(14, (c3,))
    o = jnp.arange(c3)
    w3d = jnp.zeros((h2, c3), jnp.float32).at[o // 2, o].set(w3)
    b3 = n(15, (1, c3))
    s3, t3 = bn_fold(16, 17, 18, 19, c3)

    # fc1 (c3 -> h3), fc2 (h3 -> num_classes)
    wfc1 = n(20, (c3, h3))
    bfc1 = n(21, (1, h3))
    wfc2 = n(22, (h3, num_classes))
    bfc2 = n(23, (1, num_classes))

    return dict(w1=w1, b1=b1, s1=s1, t1=t1, wres=wres, bres=bres,
                w2=w2, b2=b2, s2=s2, t2=t2, w3d=w3d, b3=b3, s3=s3, t3=t3,
                wfc1=wfc1, bfc1=bfc1, wfc2=wfc2, bfc2=bfc2)


# ----------------------------------- main -----------------------------------

if __name__ == "__main__":
    B, Tin, H, W = 2, 8, 4, 16      # (batch, time=conv-in-channels, EEG-ch, ch)
    num_classes = 10

    key = jax.random.PRNGKey(0)
    kx, kp = jax.random.split(key)
    x = jax.random.normal(kx, (B, Tin, H, W), jnp.float32)
    params = init_params(kp, tin=Tin, num_classes=num_classes)

    fwd = jax.jit(functools.partial(model3_forward, num_classes=num_classes))
    out = jax.block_until_ready(fwd(x, params))

    assert out.shape == (B, num_classes)
    assert bool(jnp.all(jnp.isfinite(out)))
    # log_softmax rows must exponentiate-sum to 1
    assert bool(jnp.allclose(jnp.sum(jnp.exp(out), axis=1), 1.0, atol=1e-3))

    # match the pure-JAX f32 reference (bf16 MXU tolerance)
    ref = model3_ref(x, params)
    assert bool(jnp.allclose(out, ref, atol=1e-1)), float(jnp.max(jnp.abs(out - ref)))

    print("KERNEL_OK")
</pallas_src>

<mosaic_0001>
module attributes {stable_mosaic.version = 11 : i64} {
  func.func @model3_kernel(%arg0: i32, %arg1: memref<2x4x16x8xf32, #tpu.memory_space<vmem>>, %arg2: memref<40x16xbf16, #tpu.memory_space<vmem>>, %arg3: memref<1x16xf32, #tpu.memory_space<vmem>>, %arg4: memref<1x16xf32, #tpu.memory_space<vmem>>, %arg5: memref<1x16xf32, #tpu.memory_space<vmem>>, %arg6: memref<16x32xbf16, #tpu.memory_space<vmem>>, %arg7: memref<1x32xf32, #tpu.memory_space<vmem>>, %arg8: memref<80x32xbf16, #tpu.memory_space<vmem>>, %arg9: memref<1x32xf32, #tpu.memory_space<vmem>>, %arg10: memref<32x64xbf16, #tpu.memory_space<vmem>>, %arg11: memref<1x64xf32, #tpu.memory_space<vmem>>, %arg12: memref<64x100xbf16, #tpu.memory_space<vmem>>, %arg13: memref<1x100xf32, #tpu.memory_space<vmem>>, %arg14: memref<100x10xbf16, #tpu.memory_space<vmem>>, %arg15: memref<1x10xf32, #tpu.memory_space<vmem>>, %arg16: memref<2x1x10xf32, #tpu.memory_space<vmem>>) attributes {dimension_semantics = [#tpu.dimension_semantics<parallel>], iteration_bounds = array<i64: 1>, scalar_prefetch = 0 : i64, scratch_operands = 0 : i64, tpu.core_type = #tpu.core_type<tc>, window_params = [{transform_indices = @transform_0, window_bounds = array<i64: 2, 4, 16, 8>}, {pipeline_mode = #tpu.pipeline_mode<synchronous>, transform_indices = @transform_1, window_bounds = array<i64: 40, 16>}, {pipeline_mode = #tpu.pipeline_mode<synchronous>, transform_indices = @transform_2, window_bounds = array<i64: 1, 16>}, {pipeline_mode = #tpu.pipeline_mode<synchronous>, transform_indices = @transform_3, window_bounds = array<i64: 1, 16>}, {pipeline_mode = #tpu.pipeline_mode<synchronous>, transform_indices = @transform_4, window_bounds = array<i64: 1, 16>}, {pipeline_mode = #tpu.pipeline_mode<synchronous>, transform_indices = @transform_5, window_bounds = array<i64: 16, 32>}, {pipeline_mode = #tpu.pipeline_mode<synchronous>, transform_indices = @transform_6, window_bounds = array<i64: 1, 32>}, {pipeline_mode = #tpu.pipeline_mode<synchronous>, transform_indices = @transform_7, window_bounds = array<i64: 80, 32>}, {pipeline_mode = #tpu.pipeline_mode<synchronous>, transform_indices = @transform_8, window_bounds = array<i64: 1, 32>}, {pipeline_mode = #tpu.pipeline_mode<synchronous>, transform_indices = @transform_9, window_bounds = array<i64: 32, 64>}, {pipeline_mode = #tpu.pipeline_mode<synchronous>, transform_indices = @transform_10, window_bounds = array<i64: 1, 64>}, {pipeline_mode = #tpu.pipeline_mode<synchronous>, transform_indices = @transform_11, window_bounds = array<i64: 64, 100>}, {pipeline_mode = #tpu.pipeline_mode<synchronous>, transform_indices = @transform_12, window_bounds = array<i64: 1, 100>}, {pipeline_mode = #tpu.pipeline_mode<synchronous>, transform_indices = @transform_13, window_bounds = array<i64: 100, 10>}, {pipeline_mode = #tpu.pipeline_mode<synchronous>, transform_indices = @transform_14, window_bounds = array<i64: 1, 10>}, {transform_indices = @transform_15, window_bounds = array<i64: 2, 1, 10>}]} {
    %c0 = arith.constant 0 : index
    %c0_0 = arith.constant 0 : index
    %c0_1 = arith.constant 0 : index
    %c0_2 = arith.constant 0 : index
    %0 = vector.load %arg1[%c0, %c0_0, %c0_1, %c0_2] : memref<2x4x16x8xf32, #tpu.memory_space<vmem>>, vector<2x4x16x8xf32>
    %1 = vector.shape_cast %0 : vector<2x4x16x8xf32> to vector<8x16x8xf32>
    %cst = arith.constant 0.000000e+00 : f32
    %2 = vector.broadcast %cst : f32 to vector<8x2x8xf32>
    %3 = tpu.concatenate %2, %1, %2 in 1 : vector<8x2x8xf32>, vector<8x16x8xf32>, vector<8x2x8xf32> -> vector<8x20x8xf32>
    %4 = vector.extract_strided_slice %3 {offsets = [0, 0, 0], sizes = [8, 16, 8], strides = [1, 1, 1]} : vector<8x20x8xf32> to vector<8x16x8xf32>
    %5 = vector.extract_strided_slice %3 {offsets = [0, 1, 0], sizes = [8, 16, 8], strides = [1, 1, 1]} : vector<8x20x8xf32> to vector<8x16x8xf32>
    %6 = vector.extract_strided_slice %3 {offsets = [0, 2, 0], sizes = [8, 16, 8], strides = [1, 1, 1]} : vector<8x20x8xf32> to vector<8x16x8xf32>
    %7 = vector.extract_strided_slice %3 {offsets = [0, 3, 0], sizes = [8, 16, 8], strides = [1, 1, 1]} : vector<8x20x8xf32> to vector<8x16x8xf32>
    %8 = vector.extract_strided_slice %3 {offsets = [0, 4, 0], sizes = [8, 16, 8], strides = [1, 1, 1]} : vector<8x20x8xf32> to vector<8x16x8xf32>
    %9 = tpu.concatenate %4, %5, %6, %7, %8 in 2 : vector<8x16x8xf32>, vector<8x16x8xf32>, vector<8x16x8xf32>, vector<8x16x8xf32>, vector<8x16x8xf32> -> vector<8x16x40xf32>
    %10 = vector.shape_cast %9 : vector<8x16x40xf32> to vector<128x40xf32>
    %11 = arith.truncf %10 : vector<128x40xf32> to vector<128x40xbf16>
    %c0_3 = arith.constant 0 : index
    %c0_4 = arith.constant 0 : index
    %12 = vector.load %arg2[%c0_3, %c0_4] : memref<40x16xbf16, #tpu.memory_space<vmem>>, vector<40x16xbf16>
    %cst_5 = arith.constant dense<0.000000e+00> : vector<128x16xf32>
    %13 = tpu.matmul %11, %12, %cst_5 {dimension_numbers = #tpu.dot_dimension_numbers<[1], [0], [0], [1], [0, 0, 1, 1], [], []>} : vector<128x40xbf16>, vector<40x16xbf16>, vector<128x16xf32> -> vector<128x16xf32>
    %c0_6 = arith.constant 0 : index
    %c0_7 = arith.constant 0 : index
    %14 = vector.load %arg3[%c0_6, %c0_7] : memref<1x16xf32, #tpu.memory_space<vmem>>, vector<1x16xf32>
    %15 = vector.broadcast %14 : vector<1x16xf32> to vector<128x16xf32>
    %16 = arith.addf %13, %15 : vector<128x16xf32>
    %cst_8 = arith.constant 0.000000e+00 : f32
    %17 = vector.broadcast %cst_8 : f32 to vector<128x16xf32>
    %18 = arith.cmpf ogt, %16, %17 : vector<128x16xf32>
    %cst_9 = arith.constant 0.000000e+00 : f32
    %19 = vector.broadcast %cst_9 : f32 to vector<128x16xf32>
    %20 = arith.minimumf %16, %19 : vector<128x16xf32>
    %21 = math.exp %20 : vector<128x16xf32>
    %cst_10 = arith.constant 1.000000e+00 : f32
    %22 = vector.broadcast %cst_10 : f32 to vector<128x16xf32>
    %23 = arith.subf %21, %22 : vector<128x16xf32>
    %24 = arith.select %18, %16, %23 : vector<128x16xi1>, vector<128x16xf32>
    %c0_11 = arith.constant 0 : index
    %c0_12 = arith.constant 0 : index
    %25 = vector.load %arg4[%c0_11, %c0_12] : memref<1x16xf32, #tpu.memory_space<vmem>>, vector<1x16xf32>
    %26 = vector.broadcast %25 : vector<1x16xf32> to vector<128x16xf32>
    %27 = arith.mulf %24, %26 : vector<128x16xf32>
    %c0_13 = arith.constant 0 : index
    %c0_14 = arith.constant 0 : index
    %28 = vector.load %arg5[%c0_13, %c0_14] : memref<1x16xf32, #tpu.memory_space<vmem>>, vector<1x16xf32>
    %29 = vector.broadcast %28 : vector<1x16xf32> to vector<128x16xf32>
    %30 = arith.addf %27, %29 : vector<128x16xf32>
    %31 = arith.truncf %30 : vector<128x16xf32> to vector<128x16xbf16>
    %c0_15 = arith.constant 0 : index
    %c0_16 = arith.constant 0 : index
    %32 = vector.load %arg6[%c0_15, %c0_16] : memref<16x32xbf16, #tpu.memory_space<vmem>>, vector<16x32xbf16>
    %cst_17 = arith.constant dense<0.000000e+00> : vector<128x32xf32>
    %33 = tpu.matmul %31, %32, %cst_17 {dimension_numbers = #tpu.dot_dimension_numbers<[1], [0], [0], [1], [0, 0, 1, 1], [], []>} : vector<128x16xbf16>, vector<16x32xbf16>, vector<128x32xf32> -> vector<128x32xf32>
    %c0_18 = arith.constant 0 : index
    %c0_19 = arith.constant 0 : index
    %34 = vector.load %arg7[%c0_18, %c0_19] : memref<1x32xf32, #tpu.memory_space<vmem>>, vector<1x32xf32>
    %35 = vector.broadcast %34 : vector<1x32xf32> to vector<128x32xf32>
    %36 = arith.addf %33, %35 : vector<128x32xf32>
    %37 = vector.shape_cast %30 : vector<128x16xf32> to vector<8x16x16xf32>
    %cst_20 = arith.constant 0.000000e+00 : f32
    %38 = vector.broadcast %cst_20 : f32 to vector<8x2x16xf32>
    %39 = tpu.concatenate %38, %37, %38 in 1 : vector<8x2x16xf32>, vector<8x16x16xf32>, vector<8x2x16xf32> -> vector<8x20x16xf32>
    %40 = vector.extract_strided_slice %39 {offsets = [0, 0, 0], sizes = [8, 16, 16], strides = [1, 1, 1]} : vector<8x20x16xf32> to vector<8x16x16xf32>
    %41 = vector.extract_strided_slice %39 {offsets = [0, 1, 0], sizes = [8, 16, 16], strides = [1, 1, 1]} : vector<8x20x16xf32> to vector<8x16x16xf32>
    %42 = vector.extract_strided_slice %39 {offsets = [0, 2, 0], sizes = [8, 16, 16], strides = [1, 1, 1]} : vector<8x20x16xf32> to vector<8x16x16xf32>
    %43 = vector.extract_strided_slice %39 {offsets = [0, 3, 0], sizes = [8, 16, 16], strides = [1, 1, 1]} : vector<8x20x16xf32> to vector<8x16x16xf32>
    %44 = vector.extract_strided_slice %39 {offsets = [0, 4, 0], sizes = [8, 16, 16], strides = [1, 1, 1]} : vector<8x20x16xf32> to vector<8x16x16xf32>
    %45 = tpu.concatenate %40, %41, %42, %43, %44 in 2 : vector<8x16x16xf32>, vector<8x16x16xf32>, vector<8x16x16xf32>, vector<8x16x16xf32>, vector<8x16x16xf32> -> vector<8x16x80xf32>
    %46 = vector.shape_cast %45 : vector<8x16x80xf32> to vector<128x80xf32>
    %47 = arith.truncf %46 : vector<128x80xf32> to vector<128x80xbf16>
    %c0_21 = arith.constant 0 : index
    %c0_22 = arith.constant 0 : index
    %48 = vector.load %arg8[%c0_21, %c0_22] : memref<80x32xbf16, #tpu.memory_space<vmem>>, vector<80x32xbf16>
    %cst_23 = arith.constant dense<0.000000e+00> : vector<128x32xf32>
    %49 = tpu.matmul %47, %48, %cst_23 {dimension_numbers = #tpu.dot_dimension_numbers<[1], [0], [0], [1], [0, 0, 1, 1], [], []>} : vector<128x80xbf16>, vector<80x32xbf16>, vector<128x32xf32> -> vector<128x32xf32>
    %c0_24 = arith.constant 0 : index
    %c0_25 = arith.constant 0 : index
    %50 = vector.load %arg9[%c0_24, %c0_25] : memref<1x32xf32, #tpu.memory_space<vmem>>, vector<1x32xf32>
    %51 = vector.broadcast %50 : vector<1x32xf32> to vector<128x32xf32>
    %52 = arith.addf %49, %51 : vector<128x32xf32>
    %53 = arith.addf %52, %36 : vector<128x32xf32>
    %cst_26 = arith.constant 0.000000e+00 : f32
    %54 = vector.broadcast %cst_26 : f32 to vector<128x32xf32>
    %55 = arith.cmpf ogt, %53, %54 : vector<128x32xf32>
    %cst_27 = arith.constant 0.000000e+00 : f32
    %56 = vector.broadcast %cst_27 : f32 to vector<128x32xf32>
    %57 = arith.minimumf %53, %56 : vector<128x32xf32>
    %58 = math.exp %57 : vector<128x32xf32>
    %cst_28 = arith.constant 1.000000e+00 : f32
    %59 = vector.broadcast %cst_28 : f32 to vector<128x32xf32>
    %60 = arith.subf %58, %59 : vector<128x32xf32>
    %61 = arith.select %55, %53, %60 : vector<128x32xi1>, vector<128x32xf32>
    %62 = arith.truncf %61 : vector<128x32xf32> to vector<128x32xbf16>
    %c0_29 = arith.constant 0 : index
    %c0_30 = arith.constant 0 : index
    %63 = vector.load %arg10[%c0_29, %c0_30] : memref<32x64xbf16, #tpu.memory_space<vmem>>, vector<32x64xbf16>
    %cst_31 = arith.constant dense<0.000000e+00> : vector<128x64xf32>
    %64 = tpu.matmul %62, %63, %cst_31 {dimension_numbers = #tpu.dot_dimension_numbers<[1], [0], [0], [1], [0, 0, 1, 1], [], []>} : vector<128x32xbf16>, vector<32x64xbf16>, vector<128x64xf32> -> vector<128x64xf32>
    %c0_32 = arith.constant 0 : index
    %c0_33 = arith.constant 0 : index
    %65 = vector.load %arg11[%c0_32, %c0_33] : memref<1x64xf32, #tpu.memory_space<vmem>>, vector<1x64xf32>
    %66 = vector.broadcast %65 : vector<1x64xf32> to vector<128x64xf32>
    %67 = arith.addf %64, %66 : vector<128x64xf32>
    %cst_34 = arith.constant 0.000000e+00 : f32
    %68 = vector.broadcast %cst_34 : f32 to vector<128x64xf32>
    %69 = arith.cmpf ogt, %67, %68 : vector<128x64xf32>
    %cst_35 = arith.constant 0.000000e+00 : f32
    %70 = vector.broadcast %cst_35 : f32 to vector<128x64xf32>
    %71 = arith.minimumf %67, %70 : vector<128x64xf32>
    %72 = math.exp %71 : vector<128x64xf32>
    %cst_36 = arith.constant 1.000000e+00 : f32
    %73 = vector.broadcast %cst_36 : f32 to vector<128x64xf32>
    %74 = arith.subf %72, %73 : vector<128x64xf32>
    %75 = arith.select %69, %67, %74 : vector<128x64xi1>, vector<128x64xf32>
    %76 = vector.shape_cast %75 : vector<128x64xf32> to vector<2x64x64xf32>
    %cst_37 = arith.constant dense<0.000000e+00> : vector<2x64xf32>
    %77 = vector.multi_reduction <add>, %76, %cst_37 [1] : vector<2x64x64xf32> to vector<2x64xf32>
    %78 = arith.truncf %77 : vector<2x64xf32> to vector<2x64xbf16>
    %c0_38 = arith.constant 0 : index
    %c0_39 = arith.constant 0 : index
    %79 = vector.load %arg12[%c0_38, %c0_39] : memref<64x100xbf16, #tpu.memory_space<vmem>>, vector<64x100xbf16>
    %cst_40 = arith.constant dense<0.000000e+00> : vector<2x100xf32>
    %80 = tpu.matmul %78, %79, %cst_40 {dimension_numbers = #tpu.dot_dimension_numbers<[1], [0], [0], [1], [0, 0, 1, 1], [], []>} : vector<2x64xbf16>, vector<64x100xbf16>, vector<2x100xf32> -> vector<2x100xf32>
    %c0_41 = arith.constant 0 : index
    %c0_42 = arith.constant 0 : index
    %81 = vector.load %arg13[%c0_41, %c0_42] : memref<1x100xf32, #tpu.memory_space<vmem>>, vector<1x100xf32>
    %82 = vector.broadcast %81 : vector<1x100xf32> to vector<2x100xf32>
    %83 = arith.addf %80, %82 : vector<2x100xf32>
    %cst_43 = arith.constant 0.000000e+00 : f32
    %84 = vector.broadcast %cst_43 : f32 to vector<2x100xf32>
    %85 = arith.cmpf ogt, %83, %84 : vector<2x100xf32>
    %cst_44 = arith.constant 0.000000e+00 : f32
    %86 = vector.broadcast %cst_44 : f32 to vector<2x100xf32>
    %87 = arith.minimumf %83, %86 : vector<2x100xf32>
    %88 = math.exp %87 : vector<2x100xf32>
    %cst_45 = arith.constant 1.000000e+00 : f32
    %89 = vector.broadcast %cst_45 : f32 to vector<2x100xf32>
    %90 = arith.subf %88, %89 : vector<2x100xf32>
    %91 = arith.select %85, %83, %90 : vector<2x100xi1>, vector<2x100xf32>
    %92 = arith.truncf %91 : vector<2x100xf32> to vector<2x100xbf16>
    %c0_46 = arith.constant 0 : index
    %c0_47 = arith.constant 0 : index
    %93 = vector.load %arg14[%c0_46, %c0_47] : memref<100x10xbf16, #tpu.memory_space<vmem>>, vector<100x10xbf16>
    %cst_48 = arith.constant dense<0.000000e+00> : vector<2x10xf32>
    %94 = tpu.matmul %92, %93, %cst_48 {dimension_numbers = #tpu.dot_dimension_numbers<[1], [0], [0], [1], [0, 0, 1, 1], [], []>} : vector<2x100xbf16>, vector<100x10xbf16>, vector<2x10xf32> -> vector<2x10xf32>
    %c0_49 = arith.constant 0 : index
    %c0_50 = arith.constant 0 : index
    %95 = vector.load %arg15[%c0_49, %c0_50] : memref<1x10xf32, #tpu.memory_space<vmem>>, vector<1x10xf32>
    %96 = vector.broadcast %95 : vector<1x10xf32> to vector<2x10xf32>
    %97 = arith.addf %94, %96 : vector<2x10xf32>
    %cst_51 = arith.constant dense<0xFF800000> : vector<2xf32>
    %98 = vector.multi_reduction <maximumf>, %97, %cst_51 [1] : vector<2x10xf32> to vector<2xf32>
    %99 = vector.shape_cast %98 : vector<2xf32> to vector<2x1xf32>
    %100 = vector.broadcast %99 : vector<2x1xf32> to vector<2x10xf32>
    %101 = arith.subf %97, %100 : vector<2x10xf32>
    %102 = math.exp %101 : vector<2x10xf32>
    %cst_52 = arith.constant dense<0.000000e+00> : vector<2xf32>
    %103 = vector.multi_reduction <add>, %102, %cst_52 [1] : vector<2x10xf32> to vector<2xf32>
    %104 = vector.shape_cast %103 : vector<2xf32> to vector<2x1xf32>
    %105 = math.log %104 : vector<2x1xf32>
    %106 = vector.broadcast %105 : vector<2x1xf32> to vector<2x10xf32>
    %107 = arith.subf %101, %106 : vector<2x10xf32>
    %108 = vector.shape_cast %107 : vector<2x10xf32> to vector<2x1x10xf32>
    %c0_53 = arith.constant 0 : index
    %c0_54 = arith.constant 0 : index
    %c0_55 = arith.constant 0 : index
    %109 = vector.load %arg16[%c0_53, %c0_54, %c0_55] : memref<2x1x10xf32, #tpu.memory_space<vmem>>, vector<2x1x10xf32>
    tpu.vector_store %arg16[%c0_53, %c0_54, %c0_55], %108 {strides = array<i32>} : memref<2x1x10xf32, #tpu.memory_space<vmem>>, vector<2x1x10xf32>,
    return
  }
  func.func @transform_0(%arg0: i32) -> (i32, i32, i32, i32) {
    %c0_i32 = arith.constant 0 : i32
    %c0_i32_0 = arith.constant 0 : i32
    %c0_i32_1 = arith.constant 0 : i32
    %c0_i32_2 = arith.constant 0 : i32
    return %arg0, %c0_i32, %c0_i32_0, %c0_i32_1 : i32, i32, i32, i32
  }
  func.func @transform_1(%arg0: i32) -> (i32, i32) {
    %c0_i32 = arith.constant 0 : i32
    %c0_i32_0 = arith.constant 0 : i32
    %c0_i32_1 = arith.constant 0 : i32
    return %c0_i32, %c0_i32_0 : i32, i32
  }
  func.func @transform_2(%arg0: i32) -> (i32, i32) {
    %c0_i32 = arith.constant 0 : i32
    %c0_i32_0 = arith.constant 0 : i32
    %c0_i32_1 = arith.constant 0 : i32
    return %c0_i32, %c0_i32_0 : i32, i32
  }
  func.func @transform_3(%arg0: i32) -> (i32, i32) {
    %c0_i32 = arith.constant 0 : i32
    %c0_i32_0 = arith.constant 0 : i32
    %c0_i32_1 = arith.constant 0 : i32
    return %c0_i32, %c0_i32_0 : i32, i32
  }
  func.func @transform_4(%arg0: i32) -> (i32, i32) {
    %c0_i32 = arith.constant 0 : i32
    %c0_i32_0 = arith.constant 0 : i32
    %c0_i32_1 = arith.constant 0 : i32
    return %c0_i32, %c0_i32_0 : i32, i32
  }
  func.func @transform_5(%arg0: i32) -> (i32, i32) {
    %c0_i32 = arith.constant 0 : i32
    %c0_i32_0 = arith.constant 0 : i32
    %c0_i32_1 = arith.constant 0 : i32
    return %c0_i32, %c0_i32_0 : i32, i32
  }
  func.func @transform_6(%arg0: i32) -> (i32, i32) {
    %c0_i32 = arith.constant 0 : i32
    %c0_i32_0 = arith.constant 0 : i32
    %c0_i32_1 = arith.constant 0 : i32
    return %c0_i32, %c0_i32_0 : i32, i32
  }
  func.func @transform_7(%arg0: i32) -> (i32, i32) {
    %c0_i32 = arith.constant 0 : i32
    %c0_i32_0 = arith.constant 0 : i32
    %c0_i32_1 = arith.constant 0 : i32
    return %c0_i32, %c0_i32_0 : i32, i32
  }
  func.func @transform_8(%arg0: i32) -> (i32, i32) {
    %c0_i32 = arith.constant 0 : i32
    %c0_i32_0 = arith.constant 0 : i32
    %c0_i32_1 = arith.constant 0 : i32
    return %c0_i32, %c0_i32_0 : i32, i32
  }
  func.func @transform_9(%arg0: i32) -> (i32, i32) {
    %c0_i32 = arith.constant 0 : i32
    %c0_i32_0 = arith.constant 0 : i32
    %c0_i32_1 = arith.constant 0 : i32
    return %c0_i32, %c0_i32_0 : i32, i32
  }
  func.func @transform_10(%arg0: i32) -> (i32, i32) {
    %c0_i32 = arith.constant 0 : i32
    %c0_i32_0 = arith.constant 0 : i32
    %c0_i32_1 = arith.constant 0 : i32
    return %c0_i32, %c0_i32_0 : i32, i32
  }
  func.func @transform_11(%arg0: i32) -> (i32, i32) {
    %c0_i32 = arith.constant 0 : i32
    %c0_i32_0 = arith.constant 0 : i32
    %c0_i32_1 = arith.constant 0 : i32
    return %c0_i32, %c0_i32_0 : i32, i32
  }
  func.func @transform_12(%arg0: i32) -> (i32, i32) {
    %c0_i32 = arith.constant 0 : i32
    %c0_i32_0 = arith.constant 0 : i32
    %c0_i32_1 = arith.constant 0 : i32
    return %c0_i32, %c0_i32_0 : i32, i32
  }
  func.func @transform_13(%arg0: i32) -> (i32, i32) {
    %c0_i32 = arith.constant 0 : i32
    %c0_i32_0 = arith.constant 0 : i32
    %c0_i32_1 = arith.constant 0 : i32
    return %c0_i32, %c0_i32_0 : i32, i32
  }
  func.func @transform_14(%arg0: i32) -> (i32, i32) {
    %c0_i32 = arith.constant 0 : i32
    %c0_i32_0 = arith.constant 0 : i32
    %c0_i32_1 = arith.constant 0 : i32
    return %c0_i32, %c0_i32_0 : i32, i32
  }
  func.func @transform_15(%arg0: i32) -> (i32, i32, i32) {
    %c0_i32 = arith.constant 0 : i32
    %c0_i32_0 = arith.constant 0 : i32
    %c0_i32_1 = arith.constant 0 : i32
    return %arg0, %c0_i32, %c0_i32_0 : i32, i32, i32
  }
}

</mosaic_0001>

<bundles_post_ra>
// kernel: model3_forward.1
= control target key start
LH: loop header
LB: loop body
LE: loop exit
PB: predicated region body
PF: predicated region fallthrough
CT: control target
= control target key end

     0   :  { %vm84_vm0 = vcmask 1041408   ;;  %vm254_vm1 = vcmask 1045504   ;;  %vm165_vm2 = vcmask 1046528   ;;  %vm343_vm3 = vcmask 1044480   ;;  %s3202_s17 = smov 16   ;;  %s3203_s18 = smov 8   ;;  %s4431_s0 = inlined_call_operand.vmem [shape: f32[2,4,16,8], index: 0, kind: input, shape index: {}]   ;;  %s4432_s1 = inlined_call_operand.vmem [shape: bf16[40,16], index: 1, kind: input, shape index: {}]   ;;  %s4433_s2 = inlined_call_operand.vmem [shape: f32[1,16], index: 2, kind: input, shape index: {}]   ;;  %s4434_s3 = inlined_call_operand.vmem [shape: f32[1,16], index: 3, kind: input, shape index: {}]   ;;  %s4435_s4 = inlined_call_operand.vmem [shape: f32[1,16], index: 4, kind: input, shape index: {}]   ;;  %s4436_s5 = inlined_call_operand.vmem [shape: bf16[16,32], index: 5, kind: input, shape index: {}]   ;;  %s4437_s6 = inlined_call_operand.vmem [shape: f32[1,32], index: 6, kind: input, shape index: {}]   ;;  %s4438_s7 = inlined_call_operand.vmem [shape: bf16[80,32], index: 7, kind: input, shape index: {}]   ;;  %s4439_s8 = inlined_call_operand.vmem [shape: f32[1,32], index: 8, kind: input, shape index: {}]   ;;  %s4440_s9 = inlined_call_operand.vmem [shape: bf16[32,64], index: 9, kind: input, shape index: {}]   ;;  %s4441_s10 = inlined_call_operand.vmem [shape: f32[1,64], index: 10, kind: input, shape index: {}]   ;;  %s4442_s11 = inlined_call_operand.vmem [shape: bf16[64,100], index: 11, kind: input, shape index: {}]   ;;  %s4443_s12 = inlined_call_operand.vmem [shape: f32[1,100], index: 12, kind: input, shape index: {}]   ;;  %s4444_s13 = inlined_call_operand.vmem [shape: bf16[100,10], index: 13, kind: input, shape index: {}]   ;;  %s4445_s14 = inlined_call_operand.vmem [shape: f32[1,10], index: 14, kind: input, shape index: {}]   ;;  %s4446_s15 = inlined_call_operand.hbm [shape: f32[2,1,10], index: 15, kind: output, shape index: {}]  }
   0x1   :  { %v52_v0 = vld [vmem:[%s4431_s0] sm:$0xff]  ;;  %v53_v1 = vld [vmem:[%s4431_s0 + $0x8] sm:$0xff]  ;;  %v54_v4 = vld [vmem:[%s4431_s0 + $0x10] sm:$0xff]  ;;  %vm432_vm4 = vcmask 1043456   ;;  %s3204_s26 = smov 24   ;;  %s3205_s27 = smov 32  }
   0x2   :  { %v85_v2 = vrot.slane %v52_v0, 6  ;;  %v86_v3 = vrot.slane %v53_v1, 6  ;;  %v55_v5 = vld [vmem:[%s4431_s0 + $0x18] sm:$0xff]  ;;  %v88_v6 = vrot.slane %v54_v4, 6  ;;  %v3308_v8 = vld [vmem:[%s4431_s0 + $0x30] sm:$0xff]  ;;  %v3054_v29 = vld [vmem:[%s4432_s1] sm:$0xff]  }
   0x3   :  { %v89_v7 = vrot.slane %v55_v5, 6  ;;  %v94_v12 = vrot.slane %v3308_v8, 6  ;;  %v3055_v34 = vld [vmem:[%s4432_s1 + $0x8] sm:$0xff]   ;;  %2558 = vmatprep.subr.bf16.mxu0 %v3054_v29  ;;  %v3358_v43 = vld [vmem:[%s4432_s1 + $0x10] ss:$0 sps:$4 sm:$0xff]   ;;  %v59_v48 = vld [vmem:[%s4431_s0 + $0x38] sm:$0xff] }
   0x4   :  { %v3311_v9 = vsel %vm84_vm0, %v85_v2, %v86_v3  ;;  %v3314_v10 = vsel %vm84_vm0, 0.0, %v85_v2  ;;  %v3317_v11 = vsel %vm84_vm0, %v86_v3, 0.0  ;;  %v3330_v20 = vsel %vm84_vm0, 0.0, %v88_v6  ;;  %2559 = vmatpush3.bf16.msra.mxu0 %v3054_v29  ;;  %v56_v61 = vld [vmem:[%s4431_s0 + $0x20] sm:$0xff]  ;;  %v57_v2 = vld [vmem:[%s4431_s0 + $0x28] sm:$0xff] }
   0x5   :  { %v255_v13 = vrot.slane %v3314_v10, 2  ;;  %v256_v14 = vrot.slane %v3311_v9, 2  ;;  %v258_v15 = vrot.slane %v3317_v11, 2  ;;  %v166_v16 = vrot.slane %v3314_v10, 1  ;;  %2560 = vmatprep.subr.bf16.mxu0 %v3055_v34 }
   0x6   :  { %v167_v17 = vrot.slane %v3311_v9, 1  ;;  %v169_v18 = vrot.slane %v3317_v11, 1  ;;  %v3327_v19 = vsel %vm84_vm0, %v88_v6, %v89_v7  ;;  %v142_v23 = vsel %vm84_vm0, %v89_v7, 0.0 }
   0x7   :  { %v257_v21 = vsel %vm254_vm1, %v255_v13, %v256_v14  ;;  %v259_v22 = vsel %vm254_vm1, %v256_v14, %v258_v15  ;;  %v260_v24 = vrot.slane %v3330_v20, 2  ;;  %v261_v28 = vrot.slane %v3327_v19, 2 }
   0x8   :  { %v2744_v25 = vpack.i.bf16 %v259_v22, %v257_v21  ;;  %v168_v26 = vsel %vm165_vm2, %v166_v16, %v167_v17  ;;  %v170_v27 = vsel %vm165_vm2, %v167_v17, %v169_v18  ;;  %v263_v31 = vrot.slane %v142_v23, 2  ;;  %2561 = vmatpush3.bf16.msra.mxu0 %v3055_v34 }
   0x9   :  { %v2734_v30 = vpack.i.bf16 %v170_v27, %v168_v26  ;;  %v171_v32 = vrot.slane %v3330_v20, 1  ;;  %v172_v33 = vrot.slane %v3327_v19, 1  ;;  %v262_v35 = vsel %vm254_vm1, %v260_v24, %v261_v28  ;;  %2722 = vmatprep.subr.msk.bf16.mxu0 %vm432_vm4, %v3358_v43 }
   0xa   :  { %2745 = vrot.lane.b32.xlu1 %v2744_v25, %s3202_s17  ;;  %v174_v36 = vrot.slane %v142_v23, 1  ;;  %v349_v37 = vrot.slane %v3330_v20, 3  ;;  %v350_v38 = vrot.slane %v3327_v19, 3  ;;  %v264_v39 = vsel %vm254_vm1, %v261_v28, %v263_v31 }
   0xb   :  { %2735 = vrot.lane.b32.xlu0 %v2734_v30, %s3203_s18  ;;  %v173_v40 = vsel %vm165_vm2, %v171_v32, %v172_v33  ;;  %v352_v41 = vrot.slane %v142_v23, 3  ;;  %v344_v42 = vrot.slane %v3314_v10, 3  ;;  %v2749_v44 = vpack.i.bf16 %v264_v39, %v262_v35 }
   0xc   :  { %v175_v45 = vsel %vm165_vm2, %v172_v33, %v174_v36  ;;  %v351_v46 = vsel %vm343_vm3, %v349_v37, %v350_v38  ;;  %v345_v47 = vrot.slane %v3311_v9, 3  ;;  %v347_v51 = vrot.slane %v3317_v11, 3 }
   0xd   :  { %v2739_v49 = vpack.i.bf16 %v175_v45, %v173_v40  ;;  %v353_v50 = vsel %vm343_vm3, %v350_v38, %v352_v41  ;;  %v438_v52 = vrot.slane %v3330_v20, 4  ;;  %v439_v55 = vrot.slane %v3327_v19, 4 }
   0xe   :  { %2750 = vrot.lane.b32.xlu1 %v2749_v44, %s3202_s17  ;;  %v2759_v53 = vpack.i.bf16 %v353_v50, %v351_v46  ;;  %v346_v54 = vsel %vm343_vm3, %v344_v42, %v345_v47  ;;  %v441_v56 = vrot.slane %v142_v23, 4  ;;  %v348_v57 = vsel %vm343_vm3, %v345_v47, %v347_v51  ;;  %v62_v44 = vld [vmem:[%s4431_s0 + $0x50] sm:$0xff] }
   0xf   :  { %2740 = vrot.lane.b32.xlu0 %v2739_v49, %s3203_s18  ;;  %v433_v58 = vrot.slane %v3314_v10, 4  ;;  %v434_v59 = vrot.slane %v3311_v9, 4  ;;  %v436_v60 = vrot.slane %v3317_v11, 4  ;;  %v2754_v62 = vpack.i.bf16 %v348_v57, %v346_v54  ;;  %v63_v49 = vld [vmem:[%s4431_s0 + $0x58] sm:$0xff]  ;;  %v60_v54 = vld [vmem:[%s4431_s0 + $0x40] sm:$0xff] }
  0x10   :  { %v440_v63 = vsel %vm432_vm4, %v438_v52, %v439_v55  ;;  %v442_v0 = vsel %vm432_vm4, %v439_v55, %v441_v56  ;;  %v95_v1 = vrot.slane %v59_v48, 6  ;;  %v3392_v6 = vsel %vm84_vm0, 0.0, %v94_v12 }
  0x11   :  { %v2769_v3 = vpack.i.bf16 %v442_v0, %v440_v63  ;;  %v435_v4 = vsel %vm432_vm4, %v433_v58, %v434_v59  ;;  %v437_v5 = vsel %vm432_vm4, %v434_v59, %v436_v60  ;;  %v181_v14 = vrot.slane %v3392_v6, 1  ;;  %v61_v63 = vld [vmem:[%s4431_s0 + $0x48] sm:$0xff] }
  0x12   :  { %2760 = vrot.lane.b32.xlu1 %v2759_v53, %s3204_s26  ;;  %v2764_v7 = vpack.i.bf16 %v437_v5, %v435_v4  ;;  %v3398_v11 = vsel %vm84_vm0, %v94_v12, %v95_v1  ;;  %v3401_v13 = vsel %vm84_vm0, %v95_v1, 0.0  ;;  %v91_v17 = vrot.slane %v56_v61, 6 }
  0x13   :  { %2755 = vrot.lane.b32.xlu0 %v2754_v62, %s3204_s26  ;;  %v182_v15 = vrot.slane %v3398_v11, 1  ;;  %v184_v16 = vrot.slane %v3401_v13, 1  ;;  %v92_v18 = vrot.slane %v57_v2, 6  ;;  %v270_v21 = vrot.slane %v3392_v6, 2 }
  0x14   :  { %v271_v8 = vrot.slane %v3398_v11, 2  ;;  %v273_v12 = vrot.slane %v3401_v13, 2  ;;  %v359_v22 = vrot.slane %v3392_v6, 3  ;;  %v3417_v26 = vsel %vm84_vm0, 0.0, %v91_v17 }
  0x15   :  { %v183_v23 = vsel %vm165_vm2, %v181_v14, %v182_v15  ;;  %v185_v24 = vsel %vm165_vm2, %v182_v15, %v184_v16  ;;  %v3414_v25 = vsel %vm84_vm0, %v91_v17, %v92_v18  ;;  %v143_v28 = vsel %vm84_vm0, %v92_v18, 0.0 }
  0x16   :  { %2770 = vrot.lane.b32.xlu1 %v2769_v3, %s3205_s27  ;;  %v2779_v27 = vpack.i.bf16 %v185_v24, %v183_v23  ;;  %v176_v29 = vrot.slane %v3417_v26, 1  ;;  %v177_v30 = vrot.slane %v3414_v25, 1  ;;  %v179_v31 = vrot.slane %v143_v28, 1 }
  0x17   :  { %2765 = vrot.lane.b32.xlu0 %v2764_v7, %s3205_s27  ;;  %v272_v32 = vsel %vm254_vm1, %v270_v21, %v271_v8  ;;  %v274_v33 = vsel %vm254_vm1, %v271_v8, %v273_v12  ;;  %v265_v34 = vrot.slane %v3417_v26, 2  ;;  %v266_v37 = vrot.slane %v3414_v25, 2 }
  0x18   :  { %v178_v35 = vsel %vm165_vm2, %v176_v29, %v177_v30  ;;  %v2789_v36 = vpack.i.bf16 %v274_v33, %v272_v32  ;;  %v268_v38 = vrot.slane %v143_v28, 2  ;;  %v180_v39 = vsel %vm165_vm2, %v177_v30, %v179_v31 }
  0x19   :  { %v360_v40 = vrot.slane %v3398_v11, 3  ;;  %v362_v41 = vrot.slane %v3401_v13, 3  ;;  %v354_v42 = vrot.slane %v3417_v26, 3  ;;  %v2774_v45 = vpack.i.bf16 %v180_v39, %v178_v35 }
  0x1a   :  { %2780 = vrot.lane.b32.xlu1 %v2779_v27, %s3203_s18  ;;  %v267_v46 = vsel %vm254_vm1, %v265_v34, %v266_v37  ;;  %v269_v47 = vsel %vm254_vm1, %v266_v37, %v268_v38  ;;  %v355_v48 = vrot.slane %v3414_v25, 3  ;;  %v357_v53 = vrot.slane %v143_v28, 3 }
  0x1b   :  { %v2784_v50 = vpack.i.bf16 %v269_v47, %v267_v46  ;;  %v361_v51 = vsel %vm343_vm3, %v359_v22, %v360_v40  ;;  %v363_v52 = vsel %vm343_vm3, %v360_v40, %v362_v41  ;;  %2775 = vrot.lane.b32.xlu0 %v2774_v45, %s3203_s18  ;;  %v448_v57 = vrot.slane %v3392_v6, 4 }
  0x1c   :  { %v2799_v55 = vpack.i.bf16 %v363_v52, %v361_v51  ;;  %v356_v56 = vsel %vm343_vm3, %v354_v42, %v355_v48  ;;  %v449_v58 = vrot.slane %v3398_v11, 4  ;;  %v358_v59 = vsel %vm343_vm3, %v355_v48, %v357_v53 }
  0x1d   :  { %v451_v60 = vrot.slane %v3401_v13, 4  ;;  %v443_v61 = vrot.slane %v3417_v26, 4  ;;  %v444_v62 = vrot.slane %v3414_v25, 4  ;;  %v2794_v0 = vpack.i.bf16 %v358_v59, %v356_v56 }
  0x1e   :  { %2790 = vrot.lane.b32.xlu1 %v2789_v36, %s3202_s17  ;;  %v450_v1 = vsel %vm432_vm4, %v448_v57, %v449_v58  ;;  %v446_v2 = vrot.slane %v143_v28, 4  ;;  %v100_v3 = vrot.slane %v62_v44, 6  ;;  %v101_v7 = vrot.slane %v63_v49, 6 }
  0x1f   :  { %v452_v4 = vsel %vm432_vm4, %v449_v58, %v451_v60  ;;  %v445_v5 = vsel %vm432_vm4, %v443_v61, %v444_v62  ;;  %v97_v13 = vrot.slane %v60_v54, 6  ;;  %2785 = vrot.lane.b32.xlu0 %v2784_v50, %s3202_s17  ;;  %v98_v17 = vrot.slane %v61_v63, 6 }
  0x20   :  { %v2809_v14 = vpack.i.bf16 %v452_v4, %v450_v1  ;;  %v447_v15 = vsel %vm432_vm4, %v444_v62, %v446_v2  ;;  %v3466_v16 = vsel %vm84_vm0, 0.0, %v100_v3  ;;  %v3469_v21 = vsel %vm84_vm0, %v100_v3, %v101_v7 }
  0x21   :  { %v2804_v18 = vpack.i.bf16 %v447_v15, %v445_v5  ;;  %v146_v8 = vsel %vm84_vm0, %v101_v7, 0.0  ;;  %v191_v12 = vrot.slane %v3466_v16, 1 }
  0x22   :  { %20 = vsyncpa [#allocation3], 0  ;;  %2800 = vrot.lane.b32.xlu1 %v2799_v55, %s3204_s26  ;;  %v192_v22 = vrot.slane %v3469_v21, 1  ;;  %v194_v23 = vrot.slane %v146_v8, 1  ;;  %v3476_v24 = vsel %vm84_vm0, %v97_v13, %v98_v17  ;;  %v3479_v27 = vsel %vm84_vm0, 0.0, %v97_v13  ;;  %v66_v59 = vld [vmem:[%s4431_s0 + $0x70] sm:$0xff] }
  0x23   :  { %v3482_v28 = vsel %vm84_vm0, %v98_v17, 0.0  ;;  %v186_v29 = vrot.slane %v3479_v27, 1  ;;  %v187_v30 = vrot.slane %v3476_v24, 1  ;;  %v280_v31 = vrot.slane %v3466_v16, 2  ;;  %2795 = vrot.lane.b32.xlu0 %v2794_v0, %s3204_s26  ;;  %v67_v60 = vld [vmem:[%s4431_s0 + $0x78] sm:$0xff]  ;;  %v64_v1 = vld [vmem:[%s4431_s0 + $0x60] sm:$0xff] }
  0x24   :  { %v193_v32 = vsel %vm165_vm2, %v191_v12, %v192_v22  ;;  %v195_v33 = vsel %vm165_vm2, %v192_v22, %v194_v23  ;;  %v189_v34 = vrot.slane %v3482_v28, 1  ;;  %v281_v35 = vrot.slane %v3469_v21, 2  ;;  %v65_v17 = vld [vmem:[%s4431_s0 + $0x68] sm:$0xff]  ;;  %s3206_s29 = smov 48   ;;  %s3207_s30 = smov 64  }
  0x25   :  { %v2819_v36 = vpack.i.bf16 %v195_v33, %v193_v32  ;;  %v188_v37 = vsel %vm165_vm2, %v186_v29, %v187_v30  ;;  %v283_v38 = vrot.slane %v146_v8, 2  ;;  %v275_v39 = vrot.slane %v3479_v27, 2 }
  0x26   :  { %2810 = vrot.lane.b32.xlu1 %v2809_v14, %s3205_s27  ;;  %v190_v40 = vsel %vm165_vm2, %v187_v30, %v189_v34  ;;  %v282_v41 = vsel %vm254_vm1, %v280_v31, %v281_v35  ;;  %v276_v42 = vrot.slane %v3476_v24, 2  ;;  %v278_v44 = vrot.slane %v3482_v28, 2 }
  0x27   :  { %v284_v45 = vsel %vm254_vm1, %v281_v35, %v283_v38  ;;  %v369_v46 = vrot.slane %v3466_v16, 3  ;;  %v370_v47 = vrot.slane %v3469_v21, 3  ;;  %2805 = vrot.lane.b32.xlu0 %v2804_v18, %s3205_s27  ;;  %v2814_v48 = vpack.i.bf16 %v190_v40, %v188_v37 }
  0x28   :  { %v2829_v49 = vpack.i.bf16 %v284_v45, %v282_v41  ;;  %v372_v50 = vrot.slane %v146_v8, 3  ;;  %v277_v51 = vsel %vm254_vm1, %v275_v39, %v276_v42  ;;  %v279_v52 = vsel %vm254_vm1, %v276_v42, %v278_v44 }
  0x29   :  { %v364_v53 = vrot.slane %v3479_v27, 3  ;;  %v365_v54 = vrot.slane %v3476_v24, 3  ;;  %v371_v55 = vsel %vm343_vm3, %v369_v46, %v370_v47  ;;  %v367_v56 = vrot.slane %v3482_v28, 3 }
  0x2a   :  { %2820 = vrot.lane.b32.xlu1 %v2819_v36, %s3203_s18  ;;  %v458_v57 = vrot.slane %v3466_v16, 4  ;;  %v459_v58 = vrot.slane %v3469_v21, 4  ;;  %v373_v61 = vsel %vm343_vm3, %v370_v47, %v372_v50  ;;  %v461_v63 = vrot.slane %v146_v8, 4 }
  0x2b   :  { %v366_v62 = vsel %vm343_vm3, %v364_v53, %v365_v54  ;;  %v453_v0 = vrot.slane %v3479_v27, 4  ;;  %2815 = vrot.lane.b32.xlu0 %v2814_v48, %s3203_s18  ;;  %v2824_v2 = vpack.i.bf16 %v279_v52, %v277_v51  ;;  %v368_v3 = vsel %vm343_vm3, %v365_v54, %v367_v56 }
  0x2c   :  { %v460_v4 = vsel %vm432_vm4, %v458_v57, %v459_v58  ;;  %v454_v5 = vrot.slane %v3476_v24, 4  ;;  %v462_v7 = vsel %vm432_vm4, %v459_v58, %v461_v63  ;;  %v456_v13 = vrot.slane %v3482_v28, 4 }
  0x2d   :  { %v106_v14 = vrot.slane %v66_v59, 6  ;;  %v107_v15 = vrot.slane %v67_v60, 6  ;;  %v2839_v18 = vpack.i.bf16 %v373_v61, %v371_v55  ;;  %v2834_v8 = vpack.i.bf16 %v368_v3, %v366_v62 }
  0x2e   :  { %2830 = vrot.lane.b32.xlu1 %v2829_v49, %s3202_s17  ;;  %v2849_v12 = vpack.i.bf16 %v462_v7, %v460_v4  ;;  %v103_v22 = vrot.slane %v64_v1, 6  ;;  %v455_v23 = vsel %vm432_vm4, %v453_v0, %v454_v5  ;;  %v104_v34 = vrot.slane %v65_v17, 6 }
  0x2f   :  { %v3536_v29 = vsel %vm84_vm0, %v106_v14, %v107_v15  ;;  %v3539_v30 = vsel %vm84_vm0, 0.0, %v106_v14  ;;  %v148_v28 = vsel %vm84_vm0, %v107_v15, 0.0  ;;  %2825 = vrot.lane.b32.xlu0 %v2824_v2, %s3202_s17  ;;  %v457_v35 = vsel %vm432_vm4, %v454_v5, %v456_v13 }
  0x30   :  { %v201_v31 = vrot.slane %v3539_v30, 1  ;;  %v202_v32 = vrot.slane %v3536_v29, 1  ;;  %v204_v33 = vrot.slane %v148_v28, 1  ;;  %v3547_v36 = vsel %vm84_vm0, 0.0, %v103_v22 }
  0x31   :  { %v290_v37 = vrot.slane %v3539_v30, 2  ;;  %v291_v38 = vrot.slane %v3536_v29, 2  ;;  %v3554_v40 = vsel %vm84_vm0, %v103_v22, %v104_v34  ;;  %v147_v41 = vsel %vm84_vm0, %v104_v34, 0.0 }
  0x32   :  { %2840 = vrot.lane.b32.xlu1 %v2839_v18, %s3204_s26  ;;  %v203_v39 = vsel %vm165_vm2, %v201_v31, %v202_v32  ;;  %v293_v42 = vrot.slane %v148_v28, 2  ;;  %v205_v44 = vsel %vm165_vm2, %v202_v32, %v204_v33  ;;  %v196_v45 = vrot.slane %v3547_v36, 1 }
  0x33   :  { %v197_v46 = vrot.slane %v3554_v40, 1  ;;  %v199_v47 = vrot.slane %v147_v41, 1  ;;  %2835 = vrot.lane.b32.xlu0 %v2834_v8, %s3204_s26  ;;  %v2844_v48 = vpack.i.bf16 %v457_v35, %v455_v23  ;;  %v285_v49 = vrot.slane %v3547_v36, 2 }
  0x34   :  { %v286_v52 = vrot.slane %v3554_v40, 2  ;;  %v288_v53 = vrot.slane %v147_v41, 2  ;;  %v2859_v54 = vpack.i.bf16 %v205_v44, %v203_v39  ;;  %v379_v55 = vrot.slane %v3539_v30, 3 }
  0x35   :  { %v198_v50 = vsel %vm165_vm2, %v196_v45, %v197_v46  ;;  %v200_v51 = vsel %vm165_vm2, %v197_v46, %v199_v47  ;;  %v380_v56 = vrot.slane %v3536_v29, 3  ;;  %v292_v57 = vsel %vm254_vm1, %v290_v37, %v291_v38 }
  0x36   :  { %2850 = vrot.lane.b32.xlu1 %v2849_v12, %s3205_s27  ;;  %v294_v58 = vsel %vm254_vm1, %v291_v38, %v293_v42  ;;  %v382_v59 = vrot.slane %v148_v28, 3  ;;  %v2854_v60 = vpack.i.bf16 %v200_v51, %v198_v50  ;;  %v374_v61 = vrot.slane %v3547_v36, 3 }
  0x37   :  { %2845 = vrot.lane.b32.xlu0 %v2844_v48, %s3205_s27  ;;  %v375_v62 = vrot.slane %v3554_v40, 3  ;;  %v377_v63 = vrot.slane %v147_v41, 3  ;;  %v287_v0 = vsel %vm254_vm1, %v285_v49, %v286_v52  ;;  %v289_v1 = vsel %vm254_vm1, %v286_v52, %v288_v53 }
  0x38   :  { %v2869_v2 = vpack.i.bf16 %v294_v58, %v292_v57  ;;  %v381_v3 = vsel %vm343_vm3, %v379_v55, %v380_v56  ;;  %v383_v4 = vsel %vm343_vm3, %v380_v56, %v382_v59  ;;  %v468_v5 = vrot.slane %v3539_v30, 4 }
  0x39   :  { %v469_v7 = vrot.slane %v3536_v29, 4  ;;  %v471_v13 = vrot.slane %v148_v28, 4  ;;  %v2864_v14 = vpack.i.bf16 %v289_v1, %v287_v0  ;;  %v376_v15 = vsel %vm343_vm3, %v374_v61, %v375_v62 }
  0x3a   :  { %2860 = vrot.lane.b32.xlu1 %v2859_v54, %s3203_s18  ;;  %v378_v17 = vsel %vm343_vm3, %v375_v62, %v377_v63  ;;  %v463_v18 = vrot.slane %v3547_v36, 4  ;;  %v464_v8 = vrot.slane %v3554_v40, 4  ;;  %v466_v12 = vrot.slane %v147_v41, 4 }
  0x3b   :  { %2855 = vrot.lane.b32.xlu0 %v2854_v60, %s3203_s18  ;;  %v650_v22 = vsel %vm432_vm4, %v3358_v43, 0  ;;  %v2879_v23 = vpack.i.bf16 %v383_v4, %v381_v3  ;;  %v470_v28 = vsel %vm432_vm4, %v468_v5, %v469_v7  ;;  %v472_v31 = vsel %vm432_vm4, %v469_v7, %v471_v13 }
  0x3c   :  { %2563 = vmatpush3.bf16.msra.mxu0 %v650_v22  ;;  %v2874_v32 = vpack.i.bf16 %v378_v17, %v376_v15  ;;  %v465_v33 = vsel %vm432_vm4, %v463_v18, %v464_v8  ;;  %v467_v34 = vsel %vm432_vm4, %v464_v8, %v466_v12  ;;  %v2889_v35 = vpack.i.bf16 %v472_v31, %v470_v28 }
  0x3d   :  { %v2884_v43 = vpack.i.bf16 %v467_v34, %v465_v33  ;;  %vm521_vm5 = vcmask 64512   ;;  %vm538_vm6 = vcmask 130048   ;;  %vm555_vm7 = vcmask 195584  }
  0x3e   :  { %2870 = vrot.lane.b32.xlu1 %v2869_v2, %s3202_s17  ;;  %vm572_vm8 = vcmask 261120   ;;  %vm624_vm9 = vcmask 326656  }
  0x3f   :  { %2865 = vrot.lane.b32.xlu0 %v2864_v14, %s3202_s17 }
  0x42   :  { %2880 = vrot.lane.b32.xlu1 %v2879_v23, %s3204_s26 }
  0x43   :  { %2875 = vrot.lane.b32.xlu0 %v2874_v32, %s3204_s26 }
  0x46   :  { %2890 = vrot.lane.b32.xlu1 %v2889_v35, %s3205_s27 }
  0x47   :  { %2885 = vrot.lane.b32.xlu0 %v2884_v43, %s3205_s27 }
  0x7c   :  { %v2746_v37 = vpop.permute.xlu1 %2745 }
  0x7d   :  { %v2736_v38 = vpop.permute.xlu0 %2735  ;;  %v2748_v47 = vunpack.i.h.bf16 %v2746_v37  ;;  %v2747_v48 = vunpack.i.l.bf16 %v2746_v37 }
  0x7e   :  { %v2738_v41 = vunpack.i.h.bf16 %v2736_v38  ;;  %v2737_v42 = vunpack.i.l.bf16 %v2736_v38 }
  0x80   :  { %v2751_v39 = vpop.permute.xlu1 %2750  ;;  %v523_v50 = vsel %vm521_vm5, %v3311_v9, %v2738_v41  ;;  %v522_v51 = vsel %vm521_vm5, %v3314_v10, %v2737_v42 }
  0x81   :  { %v2741_v44 = vpop.permute.xlu0 %2740  ;;  %v2753_v52 = vunpack.i.h.bf16 %v2751_v39  ;;  %v2752_v53 = vunpack.i.l.bf16 %v2751_v39  ;;  %v539_v9 = vsel %vm538_vm6, %v522_v51, %v2747_v48  ;;  %v540_v10 = vsel %vm538_vm6, %v523_v50, %v2748_v47 }
  0x82   :  { %v2743_v45 = vunpack.i.h.bf16 %v2741_v44  ;;  %v2742_v46 = vunpack.i.l.bf16 %v2741_v44 }
  0x84   :  { %v2761_v49 = vpop.permute.xlu1 %2760  ;;  %v525_v55 = vsel %vm521_vm5, %v3327_v19, %v2743_v45  ;;  %v524_v56 = vsel %vm521_vm5, %v3330_v20, %v2742_v46 }
  0x85   :  { %v2756_v54 = vpop.permute.xlu0 %2755  ;;  %v2763_v57 = vunpack.i.h.bf16 %v2761_v49  ;;  %v2762_v58 = vunpack.i.l.bf16 %v2761_v49  ;;  %v541_v62 = vsel %vm538_vm6, %v524_v56, %v2752_v53  ;;  %v542_v63 = vsel %vm538_vm6, %v525_v55, %v2753_v52 }
  0x86   :  { %v2758_v59 = vunpack.i.h.bf16 %v2756_v54  ;;  %v2757_v60 = vunpack.i.l.bf16 %v2756_v54 }
  0x87   :  { %v558_v20 = vsel %vm555_vm7, %v541_v62, %v2762_v58  ;;  %v559_v2 = vsel %vm555_vm7, %v542_v63, %v2763_v57 }
  0x88   :  { %v2771_v61 = vpop.permute.xlu1 %2770  ;;  %v556_v13 = vsel %vm555_vm7, %v539_v9, %v2757_v60  ;;  %v557_v14 = vsel %vm555_vm7, %v540_v10, %v2758_v59 }
  0x89   :  { %v2773_v0 = vunpack.i.h.bf16 %v2771_v61  ;;  %v2772_v19 = vunpack.i.l.bf16 %v2771_v61  ;;  %v2766_v1 = vpop.permute.xlu0 %2765 }
  0x8a   :  { %v2768_v3 = vunpack.i.h.bf16 %v2766_v1  ;;  %v2767_v4 = vunpack.i.l.bf16 %v2766_v1 }
  0x8b   :  { %v575_v5 = vsel %vm572_vm8, %v558_v20, %v2772_v19  ;;  %v576_v7 = vsel %vm572_vm8, %v559_v2, %v2773_v0 }
  0x8c   :  { %v590_v15 = vpack.c.bf16 %v576_v7, %v575_v5  ;;  %v2781_v17 = vpop.permute.xlu1 %2780  ;;  %v573_v18 = vsel %vm572_vm8, %v556_v13, %v2767_v4  ;;  %v574_v8 = vsel %vm572_vm8, %v557_v14, %v2768_v3 }
  0x8d   :  { %v589_v12 = vpack.c.bf16 %v574_v8, %v573_v18  ;;  %v2776_v22 = vpop.permute.xlu0 %2775  ;;  %v2783_v31 = vunpack.i.h.bf16 %v2781_v17  ;;  %v2782_v32 = vunpack.i.l.bf16 %v2781_v17 }
  0x8e   :  { %v2778_v33 = vunpack.i.h.bf16 %v2776_v22  ;;  %v2777_v34 = vunpack.i.l.bf16 %v2776_v22 }
  0x8f   :  { %2564 = vmatprep.mubr.msk.bf16.mxu0 %vm624_vm9, %v589_v12  ;;  %v529_v45 = vsel %vm521_vm5, %v3398_v11, %v2783_v31  ;;  %v528_v46 = vsel %vm521_vm5, %v3392_v6, %v2782_v32 }
  0x90   :  { %2565 = vmatmul.mubr.msk.bf16.vlgmr.msra.gmra.mrb[0].mxu0 %vm624_vm9, %v590_v15  ;;  %v2791_v23 = vpop.permute.xlu1 %2790  ;;  %v527_v47 = vsel %vm521_vm5, %v3414_v25, %v2778_v33  ;;  %v526_v48 = vsel %vm521_vm5, %v3417_v26, %v2777_v34 }
  0x91   :  { %v2786_v28 = vpop.permute.xlu0 %2785  ;;  %v2793_v43 = vunpack.i.h.bf16 %v2791_v23  ;;  %v2792_v37 = vunpack.i.l.bf16 %v2791_v23 }
  0x92   :  { %v2788_v38 = vunpack.i.h.bf16 %v2786_v28  ;;  %v2787_v39 = vunpack.i.l.bf16 %v2786_v28 }
  0x93   :  { %v545_v52 = vsel %vm538_vm6, %v528_v46, %v2792_v37  ;;  %v546_v53 = vsel %vm538_vm6, %v529_v45, %v2793_v43 }
  0x94   :  { %v2801_v35 = vpop.permute.xlu1 %2800  ;;  %v543_v11 = vsel %vm538_vm6, %v526_v48, %v2787_v39  ;;  %v544_v56 = vsel %vm538_vm6, %v527_v47, %v2788_v38 }
  0x95   :  { %v2803_v41 = vunpack.i.h.bf16 %v2801_v35  ;;  %v2802_v42 = vunpack.i.l.bf16 %v2801_v35  ;;  %v2796_v44 = vpop.permute.xlu0 %2795 }
  0x96   :  { %v2798_v49 = vunpack.i.h.bf16 %v2796_v44  ;;  %v2797_v50 = vunpack.i.l.bf16 %v2796_v44 }
  0x97   :  { %v562_v6 = vsel %vm555_vm7, %v545_v52, %v2802_v42  ;;  %v563_v25 = vsel %vm555_vm7, %v546_v53, %v2803_v41 }
  0x98   :  { %v2811_v51 = vpop.permute.xlu1 %2810  ;;  %v560_v61 = vsel %vm555_vm7, %v543_v11, %v2797_v50  ;;  %v561_v9 = vsel %vm555_vm7, %v544_v56, %v2798_v49 }
  0x99   :  { %v2813_v54 = vunpack.i.h.bf16 %v2811_v51  ;;  %v2812_v55 = vunpack.i.l.bf16 %v2811_v51  ;;  %v2806_v57 = vpop.permute.xlu0 %2805 }
  0x9a   :  { %v2808_v59 = vunpack.i.h.bf16 %v2806_v57  ;;  %v2807_v60 = vunpack.i.l.bf16 %v2806_v57 }
  0x9b   :  { %v579_v26 = vsel %vm572_vm8, %v562_v6, %v2812_v55  ;;  %v580_v58 = vsel %vm572_vm8, %v563_v25, %v2813_v54 }
  0x9c   :  { %v2821_v10 = vpop.permute.xlu1 %2820  ;;  %v592_v62 = vpack.c.bf16 %v580_v58, %v579_v26  ;;  %v577_v63 = vsel %vm572_vm8, %v560_v61, %v2807_v60  ;;  %v578_v0 = vsel %vm572_vm8, %v561_v9, %v2808_v59 }
  0x9d   :  { %v591_v19 = vpack.c.bf16 %v578_v0, %v577_v63  ;;  %v2816_v1 = vpop.permute.xlu0 %2815  ;;  %v2823_v3 = vunpack.i.h.bf16 %v2821_v10  ;;  %v2822_v4 = vunpack.i.l.bf16 %v2821_v10 }
  0x9e   :  { %v2818_v5 = vunpack.i.h.bf16 %v2816_v1  ;;  %v2817_v7 = vunpack.i.l.bf16 %v2816_v1 }
  0x9f   :  { %2568 = vmatprep.mubr.msk.bf16.mxu0 %vm624_vm9, %v591_v19  ;;  %v533_v23 = vsel %vm521_vm5, %v3469_v21, %v2823_v3  ;;  %v532_v28 = vsel %vm521_vm5, %v3466_v16, %v2822_v4 }
  0xa0   :  { %v2831_v20 = vpop.permute.xlu1 %2830  ;;  %2569 = vmatmul.mubr.msk.bf16.gmra.mrb[4].mxu0 %vm624_vm9, %v592_v62  ;;  %v531_v31 = vsel %vm521_vm5, %v3476_v24, %v2818_v5  ;;  %v530_v32 = vsel %vm521_vm5, %v3479_v27, %v2817_v7 }
  0xa1   :  { %v2826_v2 = vpop.permute.xlu0 %2825  ;;  %v2833_v14 = vunpack.i.h.bf16 %v2831_v20  ;;  %v2832_v15 = vunpack.i.l.bf16 %v2831_v20 }
  0xa2   :  { %v2828_v17 = vunpack.i.h.bf16 %v2826_v2  ;;  %v2827_v18 = vunpack.i.l.bf16 %v2826_v2 }
  0xa3   :  { %v549_v43 = vsel %vm538_vm6, %v532_v28, %v2832_v15  ;;  %v550_v37 = vsel %vm538_vm6, %v533_v23, %v2833_v14 }
  0xa4   :  { %v2841_v13 = vpop.permute.xlu1 %2840  ;;  %v547_v21 = vsel %vm538_vm6, %v530_v32, %v2827_v18  ;;  %v548_v41 = vsel %vm538_vm6, %v531_v31, %v2828_v17 }
  0xa5   :  { %v2843_v8 = vunpack.i.h.bf16 %v2841_v13  ;;  %v2842_v12 = vunpack.i.l.bf16 %v2841_v13  ;;  %v2836_v22 = vpop.permute.xlu0 %2835 }
  0xa6   :  { %v2838_v33 = vunpack.i.h.bf16 %v2836_v22  ;;  %v2837_v34 = vunpack.i.l.bf16 %v2836_v22 }
  0xa7   :  { %v566_v16 = vsel %vm555_vm7, %v549_v43, %v2842_v12  ;;  %v567_v24 = vsel %vm555_vm7, %v550_v37, %v2843_v8 }
  0xa8   :  { %v2851_v35 = vpop.permute.xlu1 %2850  ;;  %v564_v47 = vsel %vm555_vm7, %v547_v21, %v2837_v34  ;;  %v565_v48 = vsel %vm555_vm7, %v548_v41, %v2838_v33  ;;  %v3057_v33 = vld [vmem:[%s4436_s5] sm:$0xff]  }
  0xa9   :  { %v2853_v38 = vunpack.i.h.bf16 %v2851_v35  ;;  %v2852_v39 = vunpack.i.l.bf16 %v2851_v35  ;;  %v2846_v42 = vpop.permute.xlu0 %2845  ;;  %2580 = vmatprep.subr.bf16.mxu1 %v3057_v33  ;;  %v3691_v34 = vld [vmem:[%s4438_s7] sm:$0xff]  }
  0xaa   :  { %v2848_v45 = vunpack.i.h.bf16 %v2846_v42  ;;  %v2847_v46 = vunpack.i.l.bf16 %v2846_v42  ;;  %2581 = vmatpush3.bf16.msra.mxu1 %v3057_v33  ;;  %v3697_v35 = vld [vmem:[%s4433_s2] ss:$0 sm:$0xff] }
  0xab   :  { %v583_v27 = vsel %vm572_vm8, %v566_v16, %v2852_v39  ;;  %v584_v44 = vsel %vm572_vm8, %v567_v24, %v2853_v38  ;;  %2598 = vmatprep.subr.bf16.mxu1 %v3691_v34 }
  0xac   :  { %v2861_v49 = vpop.permute.xlu1 %2860  ;;  %v594_v50 = vpack.c.bf16 %v584_v44, %v583_v27  ;;  %v581_v51 = vsel %vm572_vm8, %v564_v47, %v2847_v46  ;;  %v582_v52 = vsel %vm572_vm8, %v565_v48, %v2848_v45 }
  0xad   :  { %v593_v53 = vpack.c.bf16 %v582_v52, %v581_v51  ;;  %v2856_v54 = vpop.permute.xlu0 %2855  ;;  %v2863_v56 = vunpack.i.h.bf16 %v2861_v49  ;;  %v2862_v6 = vunpack.i.l.bf16 %v2861_v49 }
  0xae   :  { %v2858_v25 = vunpack.i.h.bf16 %v2856_v54  ;;  %v2857_v57 = vunpack.i.l.bf16 %v2856_v54  ;;  %v3706_v54 = vld [vmem:[%s4434_s3] ss:$0 sm:$0xff] }
  0xaf   :  { %2572 = vmatprep.mubr.msk.bf16.mxu0 %vm624_vm9, %v593_v53  ;;  %v537_v63 = vsel %vm521_vm5, %v3536_v29, %v2863_v56  ;;  %v536_v0 = vsel %vm521_vm5, %v3539_v30, %v2862_v6 }
  0xb0   :  { %v2871_v55 = vpop.permute.xlu1 %2870  ;;  %2573 = vmatmul.mubr.msk.bf16.gmra.mrb[8].mxu0 %vm624_vm9, %v594_v50  ;;  %v535_v19 = vsel %vm521_vm5, %v3554_v40, %v2858_v25  ;;  %v534_v1 = vsel %vm521_vm5, %v3547_v36, %v2857_v57 }
  0xb1   :  { %v2866_v11 = vpop.permute.xlu0 %2865  ;;  %v2873_v58 = vunpack.i.h.bf16 %v2871_v55  ;;  %v2872_v59 = vunpack.i.l.bf16 %v2871_v55 }
  0xb2   :  { %v2868_v60 = vunpack.i.h.bf16 %v2866_v11  ;;  %v2867_v61 = vunpack.i.l.bf16 %v2866_v11 }
  0xb3   :  { %v553_v4 = vsel %vm538_vm6, %v536_v0, %v2872_v59  ;;  %v554_v5 = vsel %vm538_vm6, %v537_v63, %v2873_v58  ;;  %v3717_v59 = vld [vmem:[%s4435_s4] ss:$0 sm:$0xff] }
  0xb4   :  { %v2881_v26 = vpop.permute.xlu1 %2880  ;;  %v551_v29 = vsel %vm538_vm6, %v534_v1, %v2867_v61  ;;  %v552_v14 = vsel %vm538_vm6, %v535_v19, %v2868_v60 }
  0xb5   :  { %v2883_v9 = vunpack.i.h.bf16 %v2881_v26  ;;  %v2882_v10 = vunpack.i.l.bf16 %v2881_v26  ;;  %v2876_v62 = vpop.permute.xlu0 %2875 }
  0xb6   :  { %v2878_v20 = vunpack.i.h.bf16 %v2876_v62  ;;  %v2877_v2 = vunpack.i.l.bf16 %v2876_v62 }
  0xb7   :  { %v570_v30 = vsel %vm555_vm7, %v553_v4, %v2882_v10  ;;  %v571_v40 = vsel %vm555_vm7, %v554_v5, %v2883_v9 }
  0xb8   :  { %v2891_v3 = vpop.permute.xlu1 %2890  ;;  %v568_v12 = vsel %vm555_vm7, %v551_v29, %v2877_v2  ;;  %v569_v22 = vsel %vm555_vm7, %v552_v14, %v2878_v20 }
  0xb9   :  { %v2893_v7 = vunpack.i.h.bf16 %v2891_v3  ;;  %v2892_v13 = vunpack.i.l.bf16 %v2891_v3  ;;  %v2886_v15 = vpop.permute.xlu0 %2885 }
  0xba   :  { %v2888_v18 = vunpack.i.h.bf16 %v2886_v15  ;;  %v2887_v8 = vunpack.i.l.bf16 %v2886_v15 }
  0xbb   :  { %v587_v36 = vsel %vm572_vm8, %v570_v30, %v2892_v13  ;;  %v588_v17 = vsel %vm572_vm8, %v571_v40, %v2893_v7 }
  0xbc   :  { %v596_v23 = vpack.c.bf16 %v588_v17, %v587_v36  ;;  %v585_v28 = vsel %vm572_vm8, %v568_v12, %v2887_v8  ;;  %v586_v31 = vsel %vm572_vm8, %v569_v22, %v2888_v18 }
  0xbd   :  { %v595_v32 = vpack.c.bf16 %v586_v31, %v585_v28 }
  0xbf   :  { %2576 = vmatprep.mubr.msk.bf16.mxu0 %vm624_vm9, %v595_v32 }
  0xc0   :  { %2577 = vmatmul.mubr.msk.bf16.gmra.mrb[12].mxu0 %vm624_vm9, %v596_v23 }
 0x163   :  { %v2566_v43 = vpop.f32.mrb[0].mxu0 }
 0x164   :  { %v695_v37 = vadd.f32 %v2566_v43, %v3697_v35  ;;  %v686_v38 = vpop.f32.mrb[1].mxu0 }
 0x165   :  { %v687_v39 = vadd.f32 %v3697_v35, %v686_v38  ;;  %v2567_v21 = vpop.f32.mrb[2].mxu0 }
 0x166   :  { %v767_v41 = vmin.f32 %v695_v37, 0.0  ;;  %v698_v16 = vadd.f32 %v2567_v21, %v3697_v35  ;;  %v689_v24 = vpop.f32.mrb[3].mxu0  ;;  %vm751_vm10 = vcmp.gt.f32.partialorder %v695_v37, 0.0 }
 0x167   :  { %v765_v42 = vmin.f32 %v687_v39, 0.0  ;;  %v690_v27 = vadd.f32 %v3697_v35, %v689_v24  ;;  %vm749_vm11 = vcmp.gt.f32.partialorder %v687_v39, 0.0 }
 0x168   :  { %v785_v44 = vmul.f32 1.442695, %v767_v41  ;;  %v768_v45 = vmin.f32 %v698_v16, 0.0  ;;  %vm752_vm12 = vcmp.gt.f32.partialorder %v698_v16, 0.0 }
 0x169   :  { %v781_v46 = vmul.f32 1.442695, %v765_v42  ;;  %v766_v47 = vmin.f32 %v690_v27, 0.0  ;;  %vm750_vm13 = vcmp.gt.f32.partialorder %v690_v27, 0.0 }
 0x16a   :  { %3076 = vpow2.f32 %v785_v44  ;;  %v787_v48 = vmul.f32 1.442695, %v768_v45 }
 0x16b   :  { %3078 = vpow2.f32 %v781_v46  ;;  %v783_v49 = vmul.f32 1.442695, %v766_v47 }
 0x16c   :  { %3080 = vpow2.f32 %v787_v48 }
 0x16d   :  { %3082 = vpow2.f32 %v783_v49 }
 0x173   :  { %v2570_v51 = vpop.f32.mrb[4].mxu0 }
 0x174   :  { %v3077_v50 = vpop.eup %3076  ;;  %v3709_v55 = vadd.f32 %v2570_v51, %v3697_v35  ;;  %v702_v11 = vpop.f32.mrb[5].mxu0 }
 0x175   :  { %v3079_v52 = vpop.eup %3078  ;;  %v2403_v53 = vadd.f32 -1.0, %v3077_v50  ;;  %v3712_v25 = vadd.f32 %v3697_v35, %v702_v11  ;;  %v2571_v57 = vpop.f32.mrb[6].mxu0  ;;  %v3059_v11 = vld [vmem:[%s4438_s7 + $0x8] sm:$0xff]  }
 0x176   :  { %v3081_v56 = vpop.eup %3080  ;;  %v2401_v6 = vadd.f32 -1.0, %v3079_v52  ;;  %v771_v61 = vmin.f32 %v3709_v55, 0.0  ;;  %v705_v9 = vpop.f32.mrb[7].mxu0  ;;  %v3723_v20 = vadd.f32 %v2571_v57, %v3697_v35  ;;  %vm755_vm14 = vcmp.gt.f32.partialorder %v3709_v55, 0.0 }
 0x177   :  { %v3083_v26 = vpop.eup %3082  ;;  %v831_v58 = vsel %vm751_vm10, %v695_v37, %v2403_v53  ;;  %v2404_v60 = vadd.f32 -1.0, %v3081_v56  ;;  %v769_v1 = vmin.f32 %v3712_v25, 0.0  ;;  %v3728_v5 = vadd.f32 %v3697_v35, %v705_v9 }
 0x178   :  { %v854_v10 = vmul.f32 %v3706_v54, %v831_v58  ;;  %v829_v62 = vsel %vm749_vm11, %v687_v39, %v2401_v6  ;;  %v2402_v63 = vadd.f32 -1.0, %v3083_v26  ;;  %v793_v19 = vmul.f32 1.442695, %v771_v61 }
 0x179   :  { %v832_v0 = vsel %vm752_vm12, %v698_v16, %v2404_v60  ;;  %v789_v7 = vmul.f32 1.442695, %v769_v1  ;;  %v772_v13 = vmin.f32 %v3723_v20, 0.0  ;;  %v770_v30 = vmin.f32 %v3728_v5, 0.0 }
 0x17a   :  { %v877_v2 = vadd.f32 %v3717_v59, %v854_v10  ;;  %v855_v3 = vmul.f32 %v3706_v54, %v832_v0  ;;  %v830_v4 = vsel %vm750_vm13, %v690_v27, %v2402_v63  ;;  %3084 = vpow2.f32 %v793_v19 }
 0x17b   :  { %3086 = vpow2.f32 %v789_v7  ;;  %v795_v40 = vmul.f32 1.442695, %v772_v13  ;;  %v852_v15 = vmul.f32 %v3706_v54, %v829_v62  ;;  %v853_v36 = vmul.f32 %v3706_v54, %v830_v4 }
 0x17c   :  { %v1054_v29 = vrot.slane %v877_v2, 6  ;;  %v878_v14 = vadd.f32 %v3717_v59, %v855_v3  ;;  %v791_v8 = vmul.f32 1.442695, %v770_v30  ;;  %vm753_vm15 = vcmp.gt.f32.partialorder %v3712_v25, 0.0 }
 0x17d   :  { %3088 = vpow2.f32 %v795_v40  ;;  %v875_v22 = vadd.f32 %v3717_v59, %v852_v15  ;;  %v876_v23 = vadd.f32 %v3717_v59, %v853_v36  ;;  %vm756_vm5 = vcmp.gt.f32.partialorder %v3723_v20, 0.0 }
 0x17e   :  { %v3736_v17 = vsel %vm84_vm0, 0.0, %v1054_v29  ;;  %v1055_v18 = vrot.slane %v878_v14, 6  ;;  %v892_v12 = vpack.c.bf16 %v878_v14, %v877_v2  ;;  %3090 = vpow2.f32 %v791_v8  ;;  %v3060_v8 = vld [vmem:[%s4438_s7 + $0x10] sm:$0xff]  }
 0x17f   :  { %v1136_v32 = vrot.slane %v3736_v17, 1  ;;  %v891_v33 = vpack.c.bf16 %v876_v23, %v875_v22  ;;  %v1051_v43 = vrot.slane %v875_v22, 6  ;;  %v1052_v37 = vrot.slane %v876_v23, 6 }
 0x180   :  { %v3741_v28 = vsel %vm84_vm0, %v1054_v29, %v1055_v18  ;;  %v3744_v31 = vsel %vm84_vm0, %v1055_v18, 0.0  ;;  %v1224_v52 = vrot.slane %v3736_v17, 2  ;;  %vm754_vm7 = vcmp.gt.f32.partialorder %v3728_v5, 0.0 }
 0x181   :  { %v1137_v38 = vrot.slane %v3741_v28, 1  ;;  %v1139_v39 = vrot.slane %v3744_v31, 1  ;;  %v1225_v21 = vrot.slane %v3741_v28, 2  ;;  %2582 = vmatprep.mubr.msk.bf16.mxu1 %vm538_vm6, %v891_v33  ;;  %v3754_v41 = vsel %vm84_vm0, %v1051_v43, %v1052_v37 }
 0x182   :  { %v3757_v16 = vsel %vm84_vm0, 0.0, %v1051_v43  ;;  %v3760_v24 = vsel %vm84_vm0, %v1052_v37, 0.0  ;;  %2583 = vmatmul.mubr.msk.bf16.vlgmr.msra.gmra.mrb[0].mxu1 %vm538_vm6, %v892_v12  ;;  %v1132_v46 = vrot.slane %v3754_v41, 1  ;;  %v1227_v53 = vrot.slane %v3744_v31, 2 }
 0x183   :  { %v1138_v42 = vsel %vm165_vm2, %v1136_v32, %v1137_v38  ;;  %v2574_v27 = vpop.f32.mrb[8].mxu0  ;;  %v1140_v44 = vsel %vm165_vm2, %v1137_v38, %v1139_v39  ;;  %v1131_v45 = vrot.slane %v3757_v16, 1  ;;  %v1134_v47 = vrot.slane %v3760_v24, 1  ;;  %2599 = vmatpush3.bf16.msra.mxu1 %v3691_v34 }
 0x184   :  { %v3085_v48 = vpop.eup %3084  ;;  %v3769_v49 = vadd.f32 %v2574_v27, %v3697_v35  ;;  %v718_v50 = vpop.f32.mrb[9].mxu0  ;;  %v2894_v51 = vpack.i.bf16 %v1140_v44, %v1138_v42  ;;  %2600 = vmatprep.subr.bf16.mxu1 %v3059_v11  ;;  %v1226_v19 = vsel %vm254_vm1, %v1224_v52, %v1225_v21  ;;  %v1228_v7 = vsel %vm254_vm1, %v1225_v21, %v1227_v53 }
 0x185   :  { %v2407_v56 = vadd.f32 -1.0, %v3085_v48  ;;  %v3778_v6 = vadd.f32 %v3697_v35, %v718_v50  ;;  %v2575_v57 = vpop.f32.mrb[10].mxu0  ;;  %v1133_v26 = vsel %vm165_vm2, %v1131_v45, %v1132_v46  ;;  %v1135_v58 = vsel %vm165_vm2, %v1132_v46, %v1134_v47  ;;  %v3087_v60 = vpop.eup %3086  ;;  %v3061_v48 = vld [vmem:[%s4438_s7 + $0x18] sm:$0xff]  }
 0x186   :  { %v775_v61 = vmin.f32 %v3769_v49, 0.0  ;;  %v3785_v34 = vadd.f32 %v2575_v57, %v3697_v35  ;;  %2895 = vrot.lane.b32.xlu1 %v2894_v51, %s3202_s17  ;;  %v721_v9 = vpop.f32.mrb[11].mxu0  ;;  %v2914_v10 = vpack.i.bf16 %v1135_v58, %v1133_v26  ;;  %v2405_v63 = vadd.f32 -1.0, %v3087_v60 }
 0x187   :  { %v835_v62 = vsel %vm755_vm14, %v3709_v55, %v2407_v56  ;;  %v773_v0 = vmin.f32 %v3778_v6, 0.0  ;;  %v3089_v1 = vpop.eup %3088  ;;  %2601 = vmatpush3.bf16.msra.mxu1 %v3059_v11  ;;  %v3801_v30 = vadd.f32 %v3697_v35, %v721_v9  ;;  %v1312_v32 = vrot.slane %v3736_v17, 3 }
 0x188   :  { %v858_v2 = vmul.f32 %v3706_v54, %v835_v62  ;;  %v801_v3 = vmul.f32 1.442695, %v775_v61  ;;  %v776_v4 = vmin.f32 %v3785_v34, 0.0  ;;  %2915 = vrot.lane.b32.xlu0 %v2914_v10, %s3202_s17  ;;  %v3091_v13 = vpop.eup %3090  ;;  %v833_v55 = vsel %vm753_vm15, %v3712_v25, %v2405_v63  ;;  %2602 = vmatprep.subr.bf16.mxu1 %v3060_v8 }
 0x189   :  { %v2408_v29 = vadd.f32 -1.0, %v3089_v1  ;;  %v797_v14 = vmul.f32 1.442695, %v773_v0  ;;  %v856_v15 = vmul.f32 %v3706_v54, %v833_v55  ;;  %v2406_v36 = vadd.f32 -1.0, %v3091_v13 }
 0x18a   :  { %v3804_v40 = vadd.f32 %v3717_v59, %v858_v2  ;;  %3092 = vpow2.f32 %v801_v3  ;;  %v803_v25 = vmul.f32 1.442695, %v776_v4  ;;  %v2899_v43 = vpack.i.bf16 %v1228_v7, %v1226_v19 }
 0x18b   :  { %v836_v18 = vsel %vm756_vm5, %v3723_v20, %v2408_v29  ;;  %3094 = vpow2.f32 %v797_v14  ;;  %v3815_v12 = vadd.f32 %v3717_v59, %v856_v15  ;;  %v834_v23 = vsel %vm754_vm7, %v3728_v5, %v2406_v36  ;;  %2603 = vmatpush3.bf16.msra.mxu1 %v3060_v8 }
 0x18c   :  { %v859_v22 = vmul.f32 %v3706_v54, %v836_v18  ;;  %v857_v33 = vmul.f32 %v3706_v54, %v834_v23  ;;  %3096 = vpow2.f32 %v803_v25  ;;  %v774_v20 = vmin.f32 %v3801_v30, 0.0  ;;  %2900 = vrot.lane.b32.xlu1 %v2899_v43, %s3205_s27  ;;  %2604 = vmatprep.subr.bf16.mxu1 %v3061_v48 }
 0x18d   :  { %v1060_v37 = vrot.slane %v3804_v40, 6  ;;  %vm759_vm9 = vcmp.gt.f32.partialorder %v3769_v49, 0.0  ;;  %v1219_v39 = vrot.slane %v3757_v16, 2  ;;  %v1220_v42 = vrot.slane %v3754_v41, 2 }
 0x18e   :  { %v3824_v38 = vadd.f32 %v3717_v59, %v859_v22  ;;  %v3829_v5 = vadd.f32 %v3717_v59, %v857_v33  ;;  %v799_v21 = vmul.f32 1.442695, %v774_v20  ;;  %v1222_v27 = vrot.slane %v3760_v24, 2 }
 0x18f   :  { %v1057_v44 = vrot.slane %v3815_v12, 6  ;;  %v1313_v46 = vrot.slane %v3741_v28, 3  ;;  %v1315_v47 = vrot.slane %v3744_v31, 3  ;;  %v1221_v51 = vsel %vm254_vm1, %v1219_v39, %v1220_v42  ;;  %2605 = vmatpush3.bf16.msra.mxu1 %v3061_v48 }
 0x190   :  { %v1061_v45 = vrot.slane %v3824_v38, 6  ;;  %v1058_v50 = vrot.slane %v3829_v5, 6  ;;  %3098 = vpow2.f32 %v799_v21  ;;  %v1223_v52 = vsel %vm254_vm1, %v1220_v42, %v1222_v27 }
 0x191   :  { %vm757_vm10 = vcmp.gt.f32.partialorder %v3778_v6, 0.0  ;;  %v2919_v11 = vpack.i.bf16 %v1223_v52, %v1221_v51  ;;  %v1314_v56 = vsel %vm343_vm3, %v1312_v32, %v1313_v46  ;;  %vm760_vm11 = vcmp.gt.f32.partialorder %v3785_v34, 0.0 }
 0x192   :  { %v3849_v53 = vsel %vm84_vm0, %v1060_v37, %v1061_v45  ;;  %v3858_v57 = vsel %vm84_vm0, %v1057_v44, %v1058_v50  ;;  %v1316_v26 = vsel %vm343_vm3, %v1313_v46, %v1315_v47  ;;  %v1307_v58 = vrot.slane %v3757_v16, 3 }
 0x193   :  { %v2578_v60 = vpop.f32.mrb[12].mxu0  ;;  %2920 = vrot.lane.b32.xlu0 %v2919_v11, %s3205_s27  ;;  %v2904_v9 = vpack.i.bf16 %v1316_v26, %v1314_v56  ;;  %v1308_v10 = vrot.slane %v3754_v41, 3  ;;  %v1310_v62 = vrot.slane %v3760_v24, 3  ;;  %v893_v63 = vpack.c.bf16 %v3829_v5, %v3815_v12 }
 0x194   :  { %v3093_v61 = vpop.eup %3092  ;;  %v734_v0 = vpop.f32.mrb[13].mxu0  ;;  %vm758_vm12 = vcmp.gt.f32.partialorder %v3801_v30, 0.0  ;;  %v1400_v2 = vrot.slane %v3736_v17, 4  ;;  %v1401_v3 = vrot.slane %v3741_v28, 4  ;;  %v1403_v4 = vrot.slane %v3744_v31, 4 }
 0x195   :  { %v3095_v19 = vpop.eup %3094  ;;  %v2411_v1 = vadd.f32 -1.0, %v3093_v61  ;;  %v2579_v7 = vpop.f32.mrb[14].mxu0  ;;  %2905 = vrot.lane.b32.xlu1 %v2904_v9, %s3206_s29  ;;  %v1309_v55 = vsel %vm343_vm3, %v1307_v58, %v1308_v10  ;;  %v1311_v29 = vsel %vm343_vm3, %v1308_v10, %v1310_v62  ;;  %2586 = vmatprep.mubr.msk.bf16.mxu1 %vm538_vm6, %v893_v63  ;;  %v894_v14 = vpack.c.bf16 %v3824_v38, %v3804_v40 }
 0x196   :  { %v2409_v13 = vadd.f32 -1.0, %v3095_v19  ;;  %v3878_v15 = vpop.f32.mrb[15].mxu0  ;;  %v3097_v36 = vpop.eup %3096  ;;  %v2924_v18 = vpack.i.bf16 %v1311_v29, %v1309_v55  ;;  %v1402_v25 = vsel %vm432_vm4, %v1400_v2, %v1401_v3  ;;  %v1404_v8 = vsel %vm432_vm4, %v1401_v3, %v1403_v4 }
 0x197   :  { %v839_v31 = vsel %vm759_vm9, %v3769_v49, %v2411_v1  ;;  %v2412_v32 = vadd.f32 -1.0, %v3097_v36  ;;  %v2909_v33 = vpack.i.bf16 %v1404_v8, %v1402_v25  ;;  %2587 = vmatmul.mubr.msk.bf16.gmra.mrb[4].mxu1 %vm538_vm6, %v894_v14  ;;  %v3893_v49 = vadd.f32 %v2578_v60, %v3697_v35 }
 0x198   :  { %v862_v22 = vmul.f32 %v3706_v54, %v839_v31  ;;  %v837_v23 = vsel %vm757_vm10, %v3778_v6, %v2409_v13  ;;  %2925 = vrot.lane.b32.xlu0 %v2924_v18, %s3206_s29  ;;  %v1395_v43 = vrot.slane %v3757_v16, 4  ;;  %v1396_v39 = vrot.slane %v3754_v41, 4 }
 0x199   :  { %v860_v20 = vmul.f32 %v3706_v54, %v837_v23  ;;  %v840_v6 = vsel %vm760_vm11, %v3785_v34, %v2412_v32  ;;  %2910 = vrot.lane.b32.xlu1 %v2909_v33, %s3207_s30  ;;  %v1398_v42 = vrot.slane %v3760_v24, 4  ;;  %v3906_v27 = vadd.f32 %v3697_v35, %v734_v0  ;;  %v3062_v24 = vld [vmem:[%s4438_s7 + $0x20] sm:$0xff]  }
 0x19a   :  { %v3898_v21 = vadd.f32 %v3717_v59, %v862_v22  ;;  %v3099_v46 = vpop.eup %3098  ;;  %v3911_v47 = vsel %vm84_vm0, 0.0, %v1060_v37  ;;  %v863_v51 = vmul.f32 %v3706_v54, %v840_v6  ;;  %v779_v34 = vmin.f32 %v3893_v49, 0.0  ;;  %2606 = vmatprep.subr.bf16.mxu1 %v3062_v24 }
 0x19b   :  { %v3914_v48 = vadd.f32 %v3717_v59, %v860_v20  ;;  %v3924_v52 = vsel %vm84_vm0, 0.0, %v1057_v44  ;;  %v2410_v40 = vadd.f32 -1.0, %v3099_v46  ;;  %v1397_v37 = vsel %vm432_vm4, %v1395_v43, %v1396_v39  ;;  %2607 = vmatpush3.bf16.msra.mxu1 %v3062_v24 }
 0x19c   :  { %v1399_v11 = vsel %vm432_vm4, %v1396_v39, %v1398_v42  ;;  %v1066_v56 = vrot.slane %v3898_v21, 6  ;;  %v3930_v26 = vadd.f32 %v3717_v59, %v863_v51  ;;  %v809_v58 = vmul.f32 1.442695, %v779_v34 }
 0x19d   :  { %v2929_v60 = vpack.i.bf16 %v1399_v11, %v1397_v37  ;;  %v3935_v12 = vsel %vm84_vm0, %v1061_v45, 0.0  ;;  %v1063_v44 = vrot.slane %v3914_v48, 6  ;;  %v838_v61 = vsel %vm758_vm12, %v3801_v30, %v2410_v40 }
 0x19e   :  { %v777_v9 = vmin.f32 %v3906_v27, 0.0  ;;  %v3945_v10 = vsel %vm84_vm0, %v1058_v50, 0.0  ;;  %v1067_v62 = vrot.slane %v3930_v26, 6  ;;  %v861_v38 = vmul.f32 %v3706_v54, %v838_v61 }
 0x19f   :  { %3100 = vpow2.f32 %v809_v58  ;;  %2930 = vrot.lane.b32.xlu0 %v2929_v60, %s3207_s30  ;;  %v3951_v63 = vadd.f32 %v2579_v7, %v3697_v35  ;;  %v1146_v30 = vrot.slane %v3911_v47, 1  ;;  %v1147_v0 = vrot.slane %v3849_v53, 1 }
 0x1a0   :  { %v805_v45 = vmul.f32 1.442695, %v777_v9  ;;  %v3956_v5 = vsel %vm84_vm0, 0.0, %v1066_v56  ;;  %v3959_v50 = vsel %vm84_vm0, %v1066_v56, %v1067_v62  ;;  %v3962_v19 = vadd.f32 %v3717_v59, %v861_v38 }
 0x1a1   :  { %v1149_v1 = vrot.slane %v3935_v12, 1  ;;  %v3966_v2 = vsel %vm84_vm0, 0.0, %v1063_v44  ;;  %v780_v3 = vmin.f32 %v3951_v63, 0.0  ;;  %v1148_v4 = vsel %vm165_vm2, %v1146_v30, %v1147_v0 }
 0x1a2   :  { %3102 = vpow2.f32 %v805_v45  ;;  %v1064_v7 = vrot.slane %v3962_v19, 6  ;;  %vm763_vm13 = vcmp.gt.f32.partialorder %v3893_v49, 0.0  ;;  %v3975_v55 = vadd.f32 %v3697_v35, %v3878_v15 }
 0x1a3   :  { %v1150_v13 = vsel %vm165_vm2, %v1147_v0, %v1149_v1  ;;  %v1141_v29 = vrot.slane %v3924_v52, 1  ;;  %v811_v14 = vmul.f32 1.442695, %v780_v3  ;;  %v1142_v31 = vrot.slane %v3858_v57, 1 }
 0x1a4   :  { %v2934_v36 = vpack.i.bf16 %v1150_v13, %v1148_v4  ;;  %v1144_v18 = vrot.slane %v3945_v10, 1  ;;  %v3981_v25 = vsel %vm84_vm0, %v1067_v62, 0.0  ;;  %v3984_v8 = vsel %vm84_vm0, %v1063_v44, %v1064_v7 }
 0x1a5   :  { %v3987_v22 = vsel %vm84_vm0, %v1064_v7, 0.0  ;;  %v778_v35 = vmin.f32 %v3975_v55, 0.0  ;;  %vm761_vm14 = vcmp.gt.f32.partialorder %v3906_v27, 0.0  ;;  %3104 = vpow2.f32 %v811_v14 }
 0x1a6   :  { %2935 = vrot.lane.b32.xlu1 %v2934_v36, %s3202_s17  ;;  %v1143_v15 = vsel %vm165_vm2, %v1141_v29, %v1142_v31  ;;  %v1145_v23 = vsel %vm165_vm2, %v1142_v31, %v1144_v18  ;;  %v1234_v32 = vrot.slane %v3911_v47, 2  ;;  %v1235_v43 = vrot.slane %v3849_v53, 2 }
 0x1a7   :  { %v807_v33 = vmul.f32 1.442695, %v778_v35  ;;  %v2954_v20 = vpack.i.bf16 %v1145_v23, %v1143_v15  ;;  %v1237_v39 = vrot.slane %v3935_v12, 2  ;;  %v1229_v6 = vrot.slane %v3924_v52, 2 }
 0x1a8   :  { %v1230_v42 = vrot.slane %v3858_v57, 2  ;;  %v1232_v46 = vrot.slane %v3945_v10, 2  ;;  %v1322_v51 = vrot.slane %v3911_v47, 3  ;;  %v1236_v24 = vsel %vm254_vm1, %v1234_v32, %v1235_v43 }
 0x1a9   :  { %v3101_v34 = vpop.eup %3100  ;;  %3106 = vpow2.f32 %v807_v33  ;;  %2955 = vrot.lane.b32.xlu0 %v2954_v20, %s3202_s17  ;;  %v1238_v40 = vsel %vm254_vm1, %v1235_v43, %v1237_v39  ;;  %v1323_v37 = vrot.slane %v3849_v53, 3  ;;  %vm764_vm15 = vcmp.gt.f32.partialorder %v3951_v63, 0.0 }
 0x1aa   :  { %v2415_v11 = vadd.f32 -1.0, %v3101_v34  ;;  %v2939_v56 = vpack.i.bf16 %v1238_v40, %v1236_v24  ;;  %v1231_v58 = vsel %vm254_vm1, %v1229_v6, %v1230_v42  ;;  %v1233_v60 = vsel %vm254_vm1, %v1230_v42, %v1232_v46 }
 0x1ab   :  { %v2959_v44 = vpack.i.bf16 %v1233_v60, %v1231_v58  ;;  %v1324_v61 = vsel %vm343_vm3, %v1322_v51, %v1323_v37  ;;  %v1325_v9 = vrot.slane %v3935_v12, 3  ;;  %v1317_v62 = vrot.slane %v3924_v52, 3 }
 0x1ac   :  { %v3103_v38 = vpop.eup %3102  ;;  %v843_v45 = vsel %vm763_vm13, %v3893_v49, %v2415_v11  ;;  %2940 = vrot.lane.b32.xlu1 %v2939_v56, %s3205_s27  ;;  %v1318_v30 = vrot.slane %v3858_v57, 3  ;;  %v1320_v0 = vrot.slane %v3945_v10, 3  ;;  %v895_v1 = vpack.c.bf16 %v3962_v19, %v3914_v48 }
 0x1ad   :  { %v866_v3 = vmul.f32 %v3706_v54, %v843_v45  ;;  %v2413_v4 = vadd.f32 -1.0, %v3103_v38  ;;  %vm762_vm5 = vcmp.gt.f32.partialorder %v3975_v55, 0.0  ;;  %2960 = vrot.lane.b32.xlu0 %v2959_v44, %s3205_s27  ;;  %v1326_v7 = vsel %vm343_vm3, %v1323_v37, %v1325_v9 }
 0x1ae   :  { %v1410_v49 = vrot.slane %v3911_v47, 4  ;;  %v2944_v13 = vpack.i.bf16 %v1326_v7, %v1324_v61  ;;  %v1319_v29 = vsel %vm343_vm3, %v1317_v62, %v1318_v30  ;;  %v1321_v14 = vsel %vm343_vm3, %v1318_v30, %v1320_v0  ;;  %2590 = vmatprep.mubr.msk.bf16.mxu1 %vm538_vm6, %v895_v1 }
 0x1af   :  { %v1411_v48 = vrot.slane %v3849_v53, 4  ;;  %v4029_v19 = vadd.f32 %v3717_v59, %v866_v3  ;;  %v841_v36 = vsel %vm761_vm14, %v3906_v27, %v2413_v4  ;;  %v2964_v31 = vpack.i.bf16 %v1321_v14, %v1319_v29  ;;  %v3105_v35 = vpop.eup %3104 }
 0x1b0   :  { %v1413_v18 = vrot.slane %v3935_v12, 4  ;;  %v864_v15 = vmul.f32 %v3706_v54, %v841_v36  ;;  %2945 = vrot.lane.b32.xlu1 %v2944_v13, %s3206_s29  ;;  %v896_v32 = vpack.c.bf16 %v3930_v26, %v3898_v21  ;;  %v1405_v33 = vrot.slane %v3924_v52, 4 }
 0x1b1   :  { %v1412_v23 = vsel %vm432_vm4, %v1410_v49, %v1411_v48  ;;  %v1072_v20 = vrot.slane %v4029_v19, 6  ;;  %v2416_v43 = vadd.f32 -1.0, %v3105_v35  ;;  %2965 = vrot.lane.b32.xlu0 %v2964_v31, %s3206_s29  ;;  %v1406_v12 = vrot.slane %v3858_v57, 4 }
 0x1b2   :  { %v1414_v27 = vsel %vm432_vm4, %v1411_v48, %v1413_v18  ;;  %v4046_v39 = vadd.f32 %v3717_v59, %v864_v15  ;;  %2591 = vmatmul.mubr.msk.bf16.gmra.mrb[8].mxu1 %vm538_vm6, %v896_v32  ;;  %v1408_v42 = vrot.slane %v3945_v10, 4  ;;  %v1156_v21 = vrot.slane %v3956_v5, 1 }
 0x1b3   :  { %v2949_v6 = vpack.i.bf16 %v1414_v27, %v1412_v23  ;;  %v3107_v26 = vpop.eup %3106  ;;  %v4052_v46 = vsel %vm84_vm0, 0.0, %v1072_v20  ;;  %v844_v51 = vsel %vm764_vm15, %v3951_v63, %v2416_v43  ;;  %v1407_v34 = vsel %vm432_vm4, %v1405_v33, %v1406_v12 }
 0x1b4   :  { %v1157_v24 = vrot.slane %v3959_v50, 1  ;;  %v1069_v40 = vrot.slane %v4046_v39, 6  ;;  %v867_v37 = vmul.f32 %v3706_v54, %v844_v51  ;;  %v2414_v11 = vadd.f32 -1.0, %v3107_v26 }
 0x1b5   :  { %2950 = vrot.lane.b32.xlu1 %v2949_v6, %s3207_s30  ;;  %v1409_v10 = vsel %vm432_vm4, %v1406_v12, %v1408_v42  ;;  %v1159_v60 = vrot.slane %v3981_v25, 1  ;;  %v1151_v63 = vrot.slane %v3966_v2, 1  ;;  %v1152_v62 = vrot.slane %v3984_v8, 1 }
 0x1b6   :  { %v2969_v56 = vpack.i.bf16 %v1409_v10, %v1407_v34  ;;  %v1158_v58 = vsel %vm165_vm2, %v1156_v21, %v1157_v24  ;;  %v4067_v44 = vsel %vm84_vm0, 0.0, %v1069_v40  ;;  %v890_v61 = vadd.f32 %v3717_v59, %v867_v37 }
 0x1b7   :  { %v842_v9 = vsel %vm762_vm5, %v3975_v55, %v2414_v11  ;;  %v1160_v45 = vsel %vm165_vm2, %v1157_v24, %v1159_v60  ;;  %v1154_v30 = vrot.slane %v3987_v22, 1  ;;  %v1244_v0 = vrot.slane %v3956_v5, 2 }
 0x1b8   :  { %v865_v38 = vmul.f32 %v3706_v54, %v842_v9  ;;  %2970 = vrot.lane.b32.xlu0 %v2969_v56, %s3207_s30  ;;  %v1073_v1 = vrot.slane %v890_v61, 6  ;;  %v2974_v3 = vpack.i.bf16 %v1160_v45, %v1158_v58  ;;  %v1153_v4 = vsel %vm165_vm2, %v1151_v63, %v1152_v62 }
 0x1b9   :  { %v1245_v7 = vrot.slane %v3959_v50, 2  ;;  %v1155_v49 = vsel %vm165_vm2, %v1152_v62, %v1154_v30  ;;  %v1247_v54 = vrot.slane %v3981_v25, 2  ;;  %v1239_v13 = vrot.slane %v3966_v2, 2 }
 0x1ba   :  { %v888_v55 = vadd.f32 %v3717_v59, %v865_v38  ;;  %v4086_v29 = vsel %vm84_vm0, %v1072_v20, %v1073_v1  ;;  %v4089_v14 = vsel %vm84_vm0, %v1073_v1, 0.0  ;;  %2975 = vrot.lane.b32.xlu1 %v2974_v3, %s3202_s17  ;;  %v2994_v48 = vpack.i.bf16 %v1155_v49, %v1153_v4 }
 0x1bb   :  { %v1246_v36 = vsel %vm254_vm1, %v1244_v0, %v1245_v7  ;;  %v1248_v59 = vsel %vm254_vm1, %v1245_v7, %v1247_v54  ;;  %v1240_v18 = vrot.slane %v3984_v8, 2  ;;  %v1242_v35 = vrot.slane %v3987_v22, 2 }
 0x1bc   :  { %v1070_v31 = vrot.slane %v888_v55, 6  ;;  %2995 = vrot.lane.b32.xlu0 %v2994_v48, %s3202_s17  ;;  %v2979_v15 = vpack.i.bf16 %v1248_v59, %v1246_v36  ;;  %v1332_v23 = vrot.slane %v3956_v5, 3  ;;  %v1333_v32 = vrot.slane %v3959_v50, 3 }
 0x1bd   :  { %v1335_v33 = vrot.slane %v3981_v25, 3  ;;  %v1241_v27 = vsel %vm254_vm1, %v1239_v13, %v1240_v18  ;;  %v1243_v12 = vsel %vm254_vm1, %v1240_v18, %v1242_v35  ;;  %v1327_v26 = vrot.slane %v3966_v2, 3 }
 0x1be   :  { %v4101_v20 = vsel %vm84_vm0, %v1069_v40, %v1070_v31  ;;  %v4104_v43 = vsel %vm84_vm0, %v1070_v31, 0.0  ;;  %2980 = vrot.lane.b32.xlu1 %v2979_v15, %s3205_s27  ;;  %v2999_v6 = vpack.i.bf16 %v1243_v12, %v1241_v27  ;;  %v1334_v42 = vsel %vm343_vm3, %v1332_v23, %v1333_v32 }
 0x1bf   :  { %v1336_v21 = vsel %vm343_vm3, %v1333_v32, %v1335_v33  ;;  %v1328_v34 = vrot.slane %v3984_v8, 3  ;;  %v1330_v24 = vrot.slane %v3987_v22, 3  ;;  %v897_v40 = vpack.c.bf16 %v888_v55, %v4046_v39 }
 0x1c0   :  { %v2984_v51 = vpack.i.bf16 %v1336_v21, %v1334_v42  ;;  %3000 = vrot.lane.b32.xlu0 %v2999_v6, %s3205_s27  ;;  %v1420_v37 = vrot.slane %v3956_v5, 4  ;;  %v1421_v11 = vrot.slane %v3959_v50, 4  ;;  %v1423_v10 = vrot.slane %v3981_v25, 4 }
 0x1c1   :  { %v898_v56 = vpack.c.bf16 %v890_v61, %v4029_v19  ;;  %v1329_v58 = vsel %vm343_vm3, %v1327_v26, %v1328_v34  ;;  %v1331_v60 = vsel %vm343_vm3, %v1328_v34, %v1330_v24  ;;  %2594 = vmatprep.mubr.msk.bf16.mxu1 %vm538_vm6, %v897_v40  ;;  %v1415_v63 = vrot.slane %v3966_v2, 4 }
 0x1c2   :  { %v1416_v39 = vrot.slane %v3984_v8, 4  ;;  %2985 = vrot.lane.b32.xlu1 %v2984_v51, %s3206_s29  ;;  %v3004_v9 = vpack.i.bf16 %v1331_v60, %v1329_v58  ;;  %v1422_v62 = vsel %vm432_vm4, %v1420_v37, %v1421_v11  ;;  %v1424_v38 = vsel %vm432_vm4, %v1421_v11, %v1423_v10 }
 0x1c3   :  { %2595 = vmatmul.mubr.msk.bf16.gmra.mrb[12].mxu1 %vm538_vm6, %v898_v56  ;;  %v1418_v25 = vrot.slane %v3987_v22, 4  ;;  %v2989_v19 = vpack.i.bf16 %v1424_v38, %v1422_v62  ;;  %v1166_v45 = vrot.slane %v4052_v46, 1  ;;  %v1167_v30 = vrot.slane %v4086_v29, 1 }
 0x1c4   :  { %v1417_v61 = vsel %vm432_vm4, %v1415_v63, %v1416_v39  ;;  %3005 = vrot.lane.b32.xlu0 %v3004_v9, %s3206_s29  ;;  %v1169_v1 = vrot.slane %v4089_v14, 1  ;;  %v1161_v3 = vrot.slane %v4067_v44, 1  ;;  %v1162_v4 = vrot.slane %v4101_v20, 1 }
 0x1c5   :  { %v1419_v0 = vsel %vm432_vm4, %v1416_v39, %v1418_v25  ;;  %v1168_v22 = vsel %vm165_vm2, %v1166_v45, %v1167_v30  ;;  %v1164_v55 = vrot.slane %v4104_v43, 1  ;;  %v1255_v13 = vrot.slane %v4086_v29, 2 }
 0x1c6   :  { %v3009_v7 = vpack.i.bf16 %v1419_v0, %v1417_v61  ;;  %2990 = vrot.lane.b32.xlu1 %v2989_v19, %s3207_s30  ;;  %v1170_v49 = vsel %vm165_vm2, %v1167_v30, %v1169_v1  ;;  %v1163_v54 = vsel %vm165_vm2, %v1161_v3, %v1162_v4  ;;  %v1257_v48 = vrot.slane %v4089_v14, 2 }
 0x1c7   :  { %v3014_v36 = vpack.i.bf16 %v1170_v49, %v1168_v22  ;;  %v1165_v31 = vsel %vm165_vm2, %v1162_v4, %v1164_v55  ;;  %v1254_v59 = vrot.slane %v4052_v46, 2  ;;  %v1250_v18 = vrot.slane %v4101_v20, 2 }
 0x1c8   :  { %3010 = vrot.lane.b32.xlu0 %v3009_v7, %s3207_s30  ;;  %v3029_v35 = vpack.i.bf16 %v1165_v31, %v1163_v54  ;;  %v1249_v15 = vrot.slane %v4067_v44, 2  ;;  %v1252_v23 = vrot.slane %v4104_v43, 2  ;;  %v1258_v33 = vsel %vm254_vm1, %v1255_v13, %v1257_v48 }
 0x1c9   :  { %v1256_v32 = vsel %vm254_vm1, %v1254_v59, %v1255_v13  ;;  %v1343_v27 = vrot.slane %v4086_v29, 3  ;;  %v1345_v6 = vrot.slane %v4089_v14, 3  ;;  %v1342_v21 = vrot.slane %v4052_v46, 3 }
 0x1ca   :  { %3015 = vrot.lane.b32.xlu1 %v3014_v36, %s3202_s17  ;;  %v1251_v12 = vsel %vm254_vm1, %v1249_v15, %v1250_v18  ;;  %v1253_v42 = vsel %vm254_vm1, %v1250_v18, %v1252_v23  ;;  %v1338_v26 = vrot.slane %v4101_v20, 3  ;;  %v1340_v51 = vrot.slane %v4104_v43, 3 }
 0x1cb   :  { %v3019_v34 = vpack.i.bf16 %v1258_v33, %v1256_v32  ;;  %v1337_v24 = vrot.slane %v4067_v44, 3  ;;  %v1344_v40 = vsel %vm343_vm3, %v1342_v21, %v1343_v27  ;;  %v1346_v37 = vsel %vm343_vm3, %v1343_v27, %v1345_v6 }
 0x1cc   :  { %3030 = vrot.lane.b32.xlu0 %v3029_v35, %s3202_s17  ;;  %v1431_v11 = vrot.slane %v4086_v29, 4  ;;  %v1433_v10 = vrot.slane %v4089_v14, 4  ;;  %v3034_v56 = vpack.i.bf16 %v1253_v42, %v1251_v12  ;;  %v1430_v58 = vrot.slane %v4052_v46, 4 }
 0x1cd   :  { %v1339_v60 = vsel %vm343_vm3, %v1337_v24, %v1338_v26  ;;  %v1341_v63 = vsel %vm343_vm3, %v1338_v26, %v1340_v51  ;;  %v1426_v39 = vrot.slane %v4101_v20, 4  ;;  %v1428_v9 = vrot.slane %v4104_v43, 4 }
 0x1ce   :  { %3020 = vrot.lane.b32.xlu1 %v3019_v34, %s3205_s27  ;;  %v3024_v62 = vpack.i.bf16 %v1346_v37, %v1344_v40  ;;  %v1432_v38 = vsel %vm432_vm4, %v1430_v58, %v1431_v11  ;;  %v1434_v14 = vsel %vm432_vm4, %v1431_v11, %v1433_v10  ;;  %v1425_v25 = vrot.slane %v4067_v44, 4 }
 0x1cf   :  { %v3039_v19 = vpack.i.bf16 %v1341_v63, %v1339_v60  ;;  %v1429_v45 = vsel %vm432_vm4, %v1426_v39, %v1428_v9  ;;  %v3049_v30 = vpack.i.bf16 %v1434_v14, %v1432_v38  ;;  %vm1515_vm1 = vcmask 392192  }
 0x1d0   :  { %3035 = vrot.lane.b32.xlu0 %v3034_v56, %s3205_s27  ;;  %v1427_v61 = vsel %vm432_vm4, %v1425_v25, %v1426_v39  ;;  %vm1532_vm2 = vcmask 523264   ;;  %vm1604_vm3 = vcmask 654336  }
 0x1d1   :  { %v3044_v43 = vpack.i.bf16 %v1429_v45, %v1427_v61 }
 0x1d2   :  { %3025 = vrot.lane.b32.xlu1 %v3024_v62, %s3206_s29 }
 0x1d4   :  { %3040 = vrot.lane.b32.xlu0 %v3039_v19, %s3206_s29 }
 0x1d6   :  { %3050 = vrot.lane.b32.xlu1 %v3049_v30, %s3207_s30 }
 0x1d8   :  { %3045 = vrot.lane.b32.xlu0 %v3044_v43, %s3207_s30 }
 0x1f8   :  { %v2896_v0 = vpop.permute.xlu1 %2895 }
 0x1f9   :  { %v2898_v55 = vunpack.i.h.bf16 %v2896_v0  ;;  %v2897_v49 = vunpack.i.l.bf16 %v2896_v0 }
 0x1fa   :  { %v2916_v1 = vpop.permute.xlu0 %2915 }
 0x1fb   :  { %v2918_v54 = vunpack.i.h.bf16 %v2916_v1  ;;  %v2917_v13 = vunpack.i.l.bf16 %v2916_v1  ;;  %v1486_v12 = vsel %vm538_vm6, %v3741_v28, %v2898_v55  ;;  %v1485_v6 = vsel %vm538_vm6, %v3736_v17, %v2897_v49 }
 0x1fd   :  { %v1484_v42 = vsel %vm538_vm6, %v3754_v41, %v2918_v54  ;;  %v1483_v21 = vsel %vm538_vm6, %v3757_v16, %v2917_v13 }
 0x1fe   :  { %v2901_v3 = vpop.permute.xlu1 %2900 }
 0x1ff   :  { %v2903_v36 = vunpack.i.h.bf16 %v2901_v3  ;;  %v2902_v31 = vunpack.i.l.bf16 %v2901_v3 }
 0x201   :  { %v1501_v26 = vsel %vm572_vm8, %v1485_v6, %v2902_v31  ;;  %v1502_v51 = vsel %vm572_vm8, %v1486_v12, %v2903_v36 }
 0x205   :  { %v2921_v4 = vpop.permute.xlu0 %2920 }
 0x206   :  { %v2923_v59 = vunpack.i.h.bf16 %v2921_v4  ;;  %v2922_v18 = vunpack.i.l.bf16 %v2921_v4 }
 0x207   :  { %v2906_v7 = vpop.permute.xlu1 %2905 }
 0x208   :  { %v2908_v35 = vunpack.i.h.bf16 %v2906_v7  ;;  %v2907_v15 = vunpack.i.l.bf16 %v2906_v7  ;;  %v1499_v34 = vsel %vm572_vm8, %v1483_v21, %v2922_v18  ;;  %v1500_v24 = vsel %vm572_vm8, %v1484_v42, %v2923_v59 }
 0x20a   :  { %v2926_v22 = vpop.permute.xlu0 %2925  ;;  %v1518_v28 = vsel %vm1515_vm1, %v1501_v26, %v2907_v15  ;;  %v1519_v37 = vsel %vm1515_vm1, %v1502_v51, %v2908_v35 }
 0x20b   :  { %v2911_v48 = vpop.permute.xlu1 %2910  ;;  %v2928_v23 = vunpack.i.h.bf16 %v2926_v22  ;;  %v2927_v32 = vunpack.i.l.bf16 %v2926_v22 }
 0x20c   :  { %v2913_v33 = vunpack.i.h.bf16 %v2911_v48  ;;  %v2912_v27 = vunpack.i.l.bf16 %v2911_v48 }
 0x20d   :  { %v1516_v41 = vsel %vm1515_vm1, %v1499_v34, %v2927_v32  ;;  %v1517_v10 = vsel %vm1515_vm1, %v1500_v24, %v2928_v23 }
 0x20e   :  { %v1535_v16 = vsel %vm1532_vm2, %v1518_v28, %v2912_v27  ;;  %v1536_v56 = vsel %vm1532_vm2, %v1519_v37, %v2913_v33 }
 0x20f   :  { %v1550_v39 = vpack.c.bf16 %v1536_v56, %v1535_v16 }
 0x211   :  { %v2931_v40 = vpop.permute.xlu0 %2930 }
 0x212   :  { %v2933_v17 = vunpack.i.h.bf16 %v2931_v40  ;;  %v2932_v11 = vunpack.i.l.bf16 %v2931_v40 }
 0x214   :  { %v1533_v58 = vsel %vm1532_vm2, %v1516_v41, %v2932_v11  ;;  %v1534_v60 = vsel %vm1532_vm2, %v1517_v10, %v2933_v17 }
 0x215   :  { %v1549_v63 = vpack.c.bf16 %v1534_v60, %v1533_v58 }
 0x217   :  { %2608 = vmatprep.mubr.msk.bf16.mxu1 %vm1604_vm3, %v1549_v63 }
 0x218   :  { %v2936_v9 = vpop.permute.xlu1 %2935  ;;  %2609 = vmatmul.mubr.msk.bf16.vlgmr.msra.gmra.mrb[0].mxu1 %vm1604_vm3, %v1550_v39 }
 0x219   :  { %v2938_v61 = vunpack.i.h.bf16 %v2936_v9  ;;  %v2937_v45 = vunpack.i.l.bf16 %v2936_v9 }
 0x21b   :  { %v2956_v62 = vpop.permute.xlu0 %2955  ;;  %v1490_v36 = vsel %vm538_vm6, %v3849_v53, %v2938_v61  ;;  %v1489_v31 = vsel %vm538_vm6, %v3911_v47, %v2937_v45 }
 0x21c   :  { %v2958_v30 = vunpack.i.h.bf16 %v2956_v62  ;;  %v2957_v43 = vunpack.i.l.bf16 %v2956_v62 }
 0x21e   :  { %v2941_v38 = vpop.permute.xlu1 %2940  ;;  %v1488_v59 = vsel %vm538_vm6, %v3858_v57, %v2958_v30  ;;  %v1487_v18 = vsel %vm538_vm6, %v3924_v52, %v2957_v43 }
 0x21f   :  { %v2961_v14 = vpop.permute.xlu0 %2960  ;;  %v2943_v0 = vunpack.i.h.bf16 %v2941_v38  ;;  %v2942_v1 = vunpack.i.l.bf16 %v2941_v38 }
 0x220   :  { %v2963_v3 = vunpack.i.h.bf16 %v2961_v14  ;;  %v2962_v4 = vunpack.i.l.bf16 %v2961_v14 }
 0x221   :  { %v1505_v35 = vsel %vm572_vm8, %v1489_v31, %v2942_v1  ;;  %v1506_v15 = vsel %vm572_vm8, %v1490_v36, %v2943_v0 }
 0x222   :  { %v2946_v25 = vpop.permute.xlu1 %2945  ;;  %v1503_v23 = vsel %vm572_vm8, %v1487_v18, %v2962_v4  ;;  %v1504_v32 = vsel %vm572_vm8, %v1488_v59, %v2963_v3 }
 0x223   :  { %v2966_v19 = vpop.permute.xlu0 %2965  ;;  %v2948_v7 = vunpack.i.h.bf16 %v2946_v25  ;;  %v2947_v22 = vunpack.i.l.bf16 %v2946_v25 }
 0x224   :  { %v2968_v49 = vunpack.i.h.bf16 %v2966_v19  ;;  %v2967_v54 = vunpack.i.l.bf16 %v2966_v19 }
 0x225   :  { %v1522_v53 = vsel %vm1515_vm1, %v1505_v35, %v2947_v22  ;;  %v1523_v27 = vsel %vm1515_vm1, %v1506_v15, %v2948_v7 }
 0x226   :  { %v1520_v57 = vsel %vm1515_vm1, %v1503_v23, %v2967_v54  ;;  %v1521_v6 = vsel %vm1515_vm1, %v1504_v32, %v2968_v49 }
 0x227   :  { %v2951_v55 = vpop.permute.xlu1 %2950 }
 0x228   :  { %v2953_v13 = vunpack.i.h.bf16 %v2951_v55  ;;  %v2952_v48 = vunpack.i.l.bf16 %v2951_v55 }
 0x22a   :  { %v2971_v33 = vpop.permute.xlu0 %2970  ;;  %v1539_v52 = vsel %vm1532_vm2, %v1522_v53, %v2952_v48  ;;  %v1540_v42 = vsel %vm1532_vm2, %v1523_v27, %v2953_v13 }
 0x22b   :  { %v2973_v47 = vunpack.i.h.bf16 %v2971_v33  ;;  %v2972_v12 = vunpack.i.l.bf16 %v2971_v33  ;;  %v1552_v24 = vpack.c.bf16 %v1540_v42, %v1539_v52 }
 0x22c   :  { %v2976_v51 = vpop.permute.xlu1 %2975 }
 0x22d   :  { %v1537_v21 = vsel %vm1532_vm2, %v1520_v57, %v2972_v12  ;;  %v1538_v26 = vsel %vm1532_vm2, %v1521_v6, %v2973_v47  ;;  %v2978_v17 = vunpack.i.h.bf16 %v2976_v51  ;;  %v2977_v11 = vunpack.i.l.bf16 %v2976_v51 }
 0x22e   :  { %v1551_v34 = vpack.c.bf16 %v1538_v26, %v1537_v21  ;;  %v2996_v40 = vpop.permute.xlu0 %2995 }
 0x22f   :  { %v2998_v10 = vunpack.i.h.bf16 %v2996_v40  ;;  %v2997_v16 = vunpack.i.l.bf16 %v2996_v40  ;;  %v1494_v38 = vsel %vm538_vm6, %v3959_v50, %v2978_v17  ;;  %v1493_v14 = vsel %vm538_vm6, %v3956_v5, %v2977_v11 }
 0x230   :  { %2612 = vmatprep.mubr.msk.bf16.mxu1 %vm1604_vm3, %v1551_v34  ;;  %v2981_v28 = vpop.permute.xlu1 %2980 }
 0x231   :  { %2613 = vmatmul.mubr.msk.bf16.gmra.mrb[4].mxu1 %vm1604_vm3, %v1552_v24  ;;  %v2983_v56 = vunpack.i.h.bf16 %v2981_v28  ;;  %v2982_v58 = vunpack.i.l.bf16 %v2981_v28  ;;  %v1492_v45 = vsel %vm538_vm6, %v3984_v8, %v2998_v10  ;;  %v1491_v30 = vsel %vm538_vm6, %v3966_v2, %v2997_v16 }
 0x232   :  { %v3001_v37 = vpop.permute.xlu0 %3000 }
 0x233   :  { %v3003_v60 = vunpack.i.h.bf16 %v3001_v37  ;;  %v3002_v63 = vunpack.i.l.bf16 %v3001_v37  ;;  %v1509_v1 = vsel %vm572_vm8, %v1493_v14, %v2982_v58  ;;  %v1510_v3 = vsel %vm572_vm8, %v1494_v38, %v2983_v56 }
 0x234   :  { %v2986_v41 = vpop.permute.xlu1 %2985 }
 0x235   :  { %v2988_v9 = vunpack.i.h.bf16 %v2986_v41  ;;  %v2987_v62 = vunpack.i.l.bf16 %v2986_v41  ;;  %v1507_v50 = vsel %vm572_vm8, %v1491_v30, %v3002_v63  ;;  %v1508_v4 = vsel %vm572_vm8, %v1492_v45, %v3003_v60  ;;  %v3064_v45 = vld [vmem:[%s4440_s9 + $0x8] sm:$0xff]   ;;  %v2419_v30 = vld [vmem:[%s4437_s6] ss:$0 sm:$0xff] }
 0x236   :  { %v3006_v39 = vpop.permute.xlu0 %3005 }
 0x237   :  { %v3008_v25 = vunpack.i.h.bf16 %v3006_v39  ;;  %v3007_v19 = vunpack.i.l.bf16 %v3006_v39  ;;  %v1526_v7 = vsel %vm1515_vm1, %v1509_v1, %v2987_v62  ;;  %v1527_v22 = vsel %vm1515_vm1, %v1510_v3, %v2988_v9 }
 0x238   :  { %v2991_v61 = vpop.permute.xlu1 %2990 }
 0x239   :  { %v2993_v43 = vunpack.i.h.bf16 %v2991_v61  ;;  %v2992_v0 = vunpack.i.l.bf16 %v2991_v61  ;;  %v1524_v49 = vsel %vm1515_vm1, %v1507_v50, %v3007_v19  ;;  %v1525_v2 = vsel %vm1515_vm1, %v1508_v4, %v3008_v25  ;;  %v3063_v61 = vld [vmem:[%s4440_s9] sm:$0xff]  }
 0x23a   :  { %v3011_v5 = vpop.permute.xlu0 %3010  ;;  %2624 = vmatprep.subr.bf16.mxu0 %v3063_v61 }
 0x23b   :  { %v3013_v55 = vunpack.i.h.bf16 %v3011_v5  ;;  %v3012_v8 = vunpack.i.l.bf16 %v3011_v5  ;;  %v1543_v54 = vsel %vm1532_vm2, %v1526_v7, %v2992_v0  ;;  %v1544_v13 = vsel %vm1532_vm2, %v1527_v22, %v2993_v43  ;;  %2625 = vmatpush3.bf16.msra.mxu0 %v3063_v61  ;;  %v2429_v43 = vld [vmem:[%s4439_s8] ss:$0 sm:$0xff] }
 0x23c   :  { %v3016_v48 = vpop.permute.xlu1 %3015  ;;  %v1554_v35 = vpack.c.bf16 %v1544_v13, %v1543_v54  ;;  %2626 = vmatprep.subr.bf16.mxu0 %v3064_v45  ;;  %v4283_v0 = vadd.f32 %v2429_v43, %v2419_v30 }
 0x23d   :  { %v1541_v36 = vsel %vm1532_vm2, %v1524_v49, %v3012_v8  ;;  %v1542_v31 = vsel %vm1532_vm2, %v1525_v2, %v3013_v55  ;;  %v3018_v32 = vunpack.i.h.bf16 %v3016_v48  ;;  %v3017_v33 = vunpack.i.l.bf16 %v3016_v48 }
 0x23e   :  { %v1553_v59 = vpack.c.bf16 %v1542_v31, %v1541_v36  ;;  %v3031_v18 = vpop.permute.xlu0 %3030 }
 0x23f   :  { %v3033_v27 = vunpack.i.h.bf16 %v3031_v18  ;;  %v3032_v47 = vunpack.i.l.bf16 %v3031_v18  ;;  %v1498_v51 = vsel %vm538_vm6, %v4086_v29, %v3018_v32  ;;  %v1497_v34 = vsel %vm538_vm6, %v4052_v46, %v3017_v33  ;;  %2627 = vmatpush3.bf16.msra.mxu0 %v3064_v45 }
 0x240   :  { %2616 = vmatprep.mubr.msk.bf16.mxu1 %vm1604_vm3, %v1553_v59  ;;  %v3021_v15 = vpop.permute.xlu1 %3020 }
 0x241   :  { %2617 = vmatmul.mubr.msk.bf16.gmra.mrb[8].mxu1 %vm1604_vm3, %v1554_v35  ;;  %v3023_v12 = vunpack.i.h.bf16 %v3021_v15  ;;  %v3022_v57 = vunpack.i.l.bf16 %v3021_v15  ;;  %v1496_v37 = vsel %vm538_vm6, %v4101_v20, %v3033_v27  ;;  %v1495_v17 = vsel %vm538_vm6, %v4067_v44, %v3032_v47 }
 0x242   :  { %v3036_v23 = vpop.permute.xlu0 %3035 }
 0x243   :  { %v3038_v6 = vunpack.i.h.bf16 %v3036_v23  ;;  %v3037_v52 = vunpack.i.l.bf16 %v3036_v23  ;;  %v1513_v10 = vsel %vm572_vm8, %v1497_v34, %v3022_v57  ;;  %v1514_v16 = vsel %vm572_vm8, %v1498_v51, %v3023_v12 }
 0x244   :  { %v3026_v53 = vpop.permute.xlu1 %3025 }
 0x245   :  { %v3028_v21 = vunpack.i.h.bf16 %v3026_v53  ;;  %v3027_v26 = vunpack.i.l.bf16 %v3026_v53  ;;  %v1511_v29 = vsel %vm572_vm8, %v1495_v17, %v3037_v52  ;;  %v1512_v56 = vsel %vm572_vm8, %v1496_v37, %v3038_v6 }
 0x246   :  { %v3041_v42 = vpop.permute.xlu0 %3040 }
 0x247   :  { %v3043_v24 = vunpack.i.h.bf16 %v3041_v42  ;;  %v3042_v40 = vunpack.i.l.bf16 %v3041_v42  ;;  %v1530_v58 = vsel %vm1515_vm1, %v1513_v10, %v3027_v26  ;;  %v1531_v60 = vsel %vm1515_vm1, %v1514_v16, %v3028_v21 }
 0x248   :  { %v3051_v28 = vpop.permute.xlu1 %3050 }
 0x249   :  { %v3053_v11 = vunpack.i.h.bf16 %v3051_v28  ;;  %v3052_v41 = vunpack.i.l.bf16 %v3051_v28  ;;  %v1528_v39 = vsel %vm1515_vm1, %v1511_v29, %v3042_v40  ;;  %v1529_v44 = vsel %vm1515_vm1, %v1512_v56, %v3043_v24 }
 0x24a   :  { %v3046_v46 = vpop.permute.xlu0 %3045 }
 0x24b   :  { %v3048_v63 = vunpack.i.h.bf16 %v3046_v46  ;;  %v3047_v20 = vunpack.i.l.bf16 %v3046_v46  ;;  %v1547_v9 = vsel %vm1532_vm2, %v1530_v58, %v3052_v41  ;;  %v1548_v62 = vsel %vm1532_vm2, %v1531_v60, %v3053_v11 }
 0x24c   :  { %v1556_v19 = vpack.c.bf16 %v1548_v62, %v1547_v9 }
 0x24d   :  { %v1545_v38 = vsel %vm1532_vm2, %v1528_v39, %v3047_v20  ;;  %v1546_v14 = vsel %vm1532_vm2, %v1529_v44, %v3048_v63 }
 0x24e   :  { %v1555_v25 = vpack.c.bf16 %v1546_v14, %v1545_v38 }
 0x250   :  { %2620 = vmatprep.mubr.msk.bf16.mxu1 %vm1604_vm3, %v1555_v25 }
 0x251   :  { %2621 = vmatmul.mubr.msk.bf16.gmra.mrb[12].mxu1 %vm1604_vm3, %v1556_v19 }
 0x2eb   :  { %v2610_v1 = vpop.f32.mrb[0].mxu1 }
 0x2ec   :  { %v2674_v3 = vadd.f32 %v2610_v1, %v2419_v30  ;;  %v1663_v50 = vpop.f32.mrb[1].mxu1 }
 0x2ed   :  { %v2676_v4 = vadd.f32 %v2419_v30, %v1663_v50  ;;  %v2611_v5 = vpop.f32.mrb[2].mxu1 }
 0x2ee   :  { %v2675_v7 = vadd.f32 %v2674_v3, %v2429_v43  ;;  %v2679_v22 = vadd.f32 %v4283_v0, %v2611_v5  ;;  %v1666_v55 = vpop.f32.mrb[3].mxu1 }
 0x2ef   :  { %v2677_v8 = vadd.f32 %v2676_v4, %v2429_v43  ;;  %v2681_v49 = vadd.f32 %v4283_v0, %v1666_v55 }
 0x2f0   :  { %v1760_v2 = vmin.f32 %v2675_v7, 0.0  ;;  %v1761_v54 = vmin.f32 %v2679_v22, 0.0  ;;  %vm1744_vm4 = vcmp.gt.f32.partialorder %v2675_v7, 0.0  ;;  %vm1745_vm7 = vcmp.gt.f32.partialorder %v2679_v22, 0.0 }
 0x2f1   :  { %v1758_v13 = vmin.f32 %v2677_v8, 0.0  ;;  %v1759_v48 = vmin.f32 %v2681_v49, 0.0  ;;  %vm1742_vm6 = vcmp.gt.f32.partialorder %v2677_v8, 0.0  ;;  %vm1743_vm9 = vcmp.gt.f32.partialorder %v2681_v49, 0.0 }
 0x2f2   :  { %v1778_v36 = vmul.f32 1.442695, %v1760_v2  ;;  %v1780_v31 = vmul.f32 1.442695, %v1761_v54 }
 0x2f3   :  { %v1774_v59 = vmul.f32 1.442695, %v1758_v13  ;;  %v1776_v18 = vmul.f32 1.442695, %v1759_v48 }
 0x2f4   :  { %3108 = vpow2.f32 %v1778_v36 }
 0x2f5   :  { %3110 = vpow2.f32 %v1774_v59 }
 0x2f6   :  { %3112 = vpow2.f32 %v1780_v31 }
 0x2f7   :  { %3114 = vpow2.f32 %v1776_v18 }
 0x2fe   :  { %v3109_v35 = vpop.eup %3108 }
 0x2ff   :  { %v3111_v15 = vpop.eup %3110  ;;  %v2445_v23 = vadd.f32 -1.0, %v3109_v35 }
 0x300   :  { %v3113_v32 = vpop.eup %3112  ;;  %v2443_v33 = vadd.f32 -1.0, %v3111_v15 }
 0x301   :  { %v3115_v53 = vpop.eup %3114  ;;  %v2446_v27 = vadd.f32 -1.0, %v3113_v32  ;;  %v1824_v47 = vsel %vm1744_vm4, %v2675_v7, %v2445_v23 }
 0x302   :  { %v2444_v12 = vadd.f32 -1.0, %v3115_v53  ;;  %v1822_v57 = vsel %vm1742_vm6, %v2677_v8, %v2443_v33 }
 0x303   :  { %v1825_v6 = vsel %vm1745_vm7, %v2679_v22, %v2446_v27 }
 0x304   :  { %v2614_v52 = vpop.f32.mrb[4].mxu1  ;;  %v1839_v42 = vpack.c.bf16 %v1825_v6, %v1824_v47  ;;  %v1823_v21 = vsel %vm1743_vm9, %v2681_v49, %v2444_v12  ;;  %vm3209_vm9 = vmmov 0  }
 0x305   :  { %v2683_v26 = vadd.f32 %v4283_v0, %v2614_v52  ;;  %v1679_v51 = vpop.f32.mrb[5].mxu1  ;;  %v1838_v34 = vpack.c.bf16 %v1823_v21, %v1822_v57 }
 0x306   :  { %v2685_v24 = vadd.f32 %v4283_v0, %v1679_v51  ;;  %v2615_v40 = vpop.f32.mrb[6].mxu1 }
 0x307   :  { %v1764_v28 = vmin.f32 %v2683_v26, 0.0  ;;  %v2687_v37 = vadd.f32 %v4283_v0, %v2615_v40  ;;  %v1682_v17 = vpop.f32.mrb[7].mxu1  ;;  %2628 = vmatprep.mubr.msk.bf16.mxu0 %vm572_vm8, %v1838_v34  ;;  %vm1748_vm10 = vcmp.gt.f32.partialorder %v2683_v26, 0.0 }
 0x308   :  { %v1762_v11 = vmin.f32 %v2685_v24, 0.0  ;;  %v2689_v41 = vadd.f32 %v4283_v0, %v1682_v17  ;;  %2629 = vmatmul.mubr.msk.bf16.vlgmr.msra.gmra.mrb[16].mxu0 %vm572_vm8, %v1839_v42  ;;  %vm1746_vm11 = vcmp.gt.f32.partialorder %v2685_v24, 0.0 }
 0x309   :  { %v1786_v10 = vmul.f32 1.442695, %v1764_v28  ;;  %v1765_v16 = vmin.f32 %v2687_v37, 0.0  ;;  %vm1749_vm12 = vcmp.gt.f32.partialorder %v2687_v37, 0.0 }
 0x30a   :  { %v1782_v29 = vmul.f32 1.442695, %v1762_v11  ;;  %v1763_v56 = vmin.f32 %v2689_v41, 0.0  ;;  %vm1747_vm13 = vcmp.gt.f32.partialorder %v2689_v41, 0.0 }
 0x30b   :  { %3116 = vpow2.f32 %v1786_v10  ;;  %v1788_v46 = vmul.f32 1.442695, %v1765_v16 }
 0x30c   :  { %3118 = vpow2.f32 %v1782_v29  ;;  %v1784_v58 = vmul.f32 1.442695, %v1763_v56 }
 0x30d   :  { %3120 = vpow2.f32 %v1788_v46 }
 0x30e   :  { %3122 = vpow2.f32 %v1784_v58 }
 0x314   :  { %v2618_v63 = vpop.f32.mrb[8].mxu1 }
 0x315   :  { %v3117_v60 = vpop.eup %3116  ;;  %v4294_v44 = vadd.f32 %v4283_v0, %v2618_v63  ;;  %v1695_v9 = vpop.f32.mrb[9].mxu1 }
 0x316   :  { %v3119_v20 = vpop.eup %3118  ;;  %v2449_v39 = vadd.f32 -1.0, %v3117_v60  ;;  %v4297_v14 = vadd.f32 %v4283_v0, %v1695_v9  ;;  %v2619_v25 = vpop.f32.mrb[10].mxu1 }
 0x317   :  { %v3121_v62 = vpop.eup %3120  ;;  %v2447_v38 = vadd.f32 -1.0, %v3119_v20  ;;  %v1768_v45 = vmin.f32 %v4294_v44, 0.0  ;;  %v1698_v30 = vpop.f32.mrb[11].mxu1  ;;  %v2695_v5 = vadd.f32 %v4283_v0, %v2619_v25  ;;  %vm1752_vm14 = vcmp.gt.f32.partialorder %v4294_v44, 0.0 }
 0x318   :  { %v3123_v19 = vpop.eup %3122  ;;  %v2450_v61 = vadd.f32 -1.0, %v3121_v62  ;;  %v1828_v43 = vsel %vm1748_vm10, %v2683_v26, %v2449_v39  ;;  %v1766_v3 = vmin.f32 %v4297_v14, 0.0  ;;  %v2697_v7 = vadd.f32 %v4283_v0, %v1698_v30  ;;  %v3067_v30 = vld [vmem:[%s4442_s11 + $0x10] sm:$0xff]  }
 0x319   :  { %v2448_v1 = vadd.f32 -1.0, %v3123_v19  ;;  %v1794_v4 = vmul.f32 1.442695, %v1768_v45  ;;  %v1826_v22 = vsel %vm1746_vm11, %v2685_v24, %v2447_v38  ;;  %v1769_v54 = vmin.f32 %v2695_v5, 0.0  ;;  %v3065_v19 = vld [vmem:[%s4442_s11] sm:$0xff]   ;;  %v3066_v45 = vld [vmem:[%s4442_s11 + $0x8] sm:$0xff]  }
 0x31a   :  { %v1829_v50 = vsel %vm1749_vm12, %v2687_v37, %v2450_v61  ;;  %v1790_v49 = vmul.f32 1.442695, %v1766_v3  ;;  %v1767_v13 = vmin.f32 %v2697_v7, 0.0  ;;  %vm1750_vm15 = vcmp.gt.f32.partialorder %v4297_v14, 0.0  ;;  %v3070_v3 = vld [vmem:[%s4444_s13 + $0x8] sm:$0xff]  }
 0x31b   :  { %v1841_v55 = vpack.c.bf16 %v1829_v50, %v1828_v43  ;;  %v1827_v8 = vsel %vm1747_vm13, %v2689_v41, %v2448_v1  ;;  %3124 = vpow2.f32 %v1794_v4  ;;  %v1796_v48 = vmul.f32 1.442695, %v1769_v54  ;;  %v3069_v43 = vld [vmem:[%s4444_s13] sm:$0xff]   ;;  %v3068_v1 = vld [vmem:[%s4442_s11 + $0x18] sm:$0xff]  }
 0x31c   :  { %v1840_v2 = vpack.c.bf16 %v1827_v8, %v1826_v22  ;;  %3126 = vpow2.f32 %v1790_v49  ;;  %v1792_v36 = vmul.f32 1.442695, %v1767_v13  ;;  %vm1753_vm5 = vcmp.gt.f32.partialorder %v2695_v5, 0.0  ;;  %v4351_v50 = vld [vmem:[%s4441_s10] ss:$0 sm:$0xff] }
 0x31d   :  { %3128 = vpow2.f32 %v1796_v48  ;;  %vm1751_vm1 = vcmp.gt.f32.partialorder %v2697_v7, 0.0  ;;  %v3208_v61 = vmov 0.0  }
 0x31e   :  { %2632 = vmatprep.mubr.msk.bf16.mxu0 %vm572_vm8, %v1840_v2  ;;  %3130 = vpow2.f32 %v1792_v36  ;;  %2644 = vmatprep.subr.bf16.mxu1 %v3208_v61 }
 0x31f   :  { %2633 = vmatmul.mubr.msk.bf16.gmra.mrb[20].mxu0 %vm572_vm8, %v1841_v55  ;;  %2656 = vmatprep.subr.bf16.mxu0 %v3208_v61 }
 0x320   :  { %2645 = vmatpush3.bf16.msra.mxu1 %v3065_v19  ;;  %2652 = vmatprep.mubr.msk.bf16.mxu1 %vm3209_vm9, %v3208_v61 }
 0x321   :  { %2646 = vmatprep.subr.bf16.mxu1 %v3208_v61  ;;  %2657 = vmatpush3.bf16.msra.mxu0 %v3069_v43 }
 0x322   :  { %2658 = vmatprep.subr.bf16.mxu0 %v3208_v61 }
 0x324   :  { %v2622_v31 = vpop.f32.mrb[12].mxu1  ;;  %2647 = vmatpush3.bf16.msra.mxu1 %v3066_v45 }
 0x325   :  { %v3125_v59 = vpop.eup %3124  ;;  %v2699_v18 = vadd.f32 %v4283_v0, %v2622_v31  ;;  %v1711_v35 = vpop.f32.mrb[13].mxu1  ;;  %2648 = vmatprep.subr.bf16.mxu1 %v3208_v61  ;;  %2659 = vmatpush3.bf16.msra.mxu0 %v3070_v3 }
 0x326   :  { %v3127_v15 = vpop.eup %3126  ;;  %v2701_v23 = vadd.f32 %v4283_v0, %v1711_v35  ;;  %v2623_v32 = vpop.f32.mrb[14].mxu1  ;;  %v2453_v47 = vadd.f32 -1.0, %v3125_v59  ;;  %2660 = vmatprep.subr.bf16.mxu0 %v3208_v61 }
 0x327   :  { %v1772_v33 = vmin.f32 %v2699_v18, 0.0  ;;  %v2703_v53 = vadd.f32 %v4283_v0, %v2623_v32  ;;  %v1714_v27 = vpop.f32.mrb[15].mxu1  ;;  %v3129_v6 = vpop.eup %3128  ;;  %v2451_v52 = vadd.f32 -1.0, %v3127_v15  ;;  %vm1756_vm3 = vcmp.gt.f32.partialorder %v2699_v18, 0.0 }
 0x328   :  { %v1770_v12 = vmin.f32 %v2701_v23, 0.0  ;;  %v2705_v57 = vadd.f32 %v4283_v0, %v1714_v27  ;;  %v3131_v26 = vpop.eup %3130  ;;  %v2454_v51 = vadd.f32 -1.0, %v3129_v6  ;;  %v1832_v37 = vsel %vm1752_vm14, %v4294_v44, %v2453_v47  ;;  %2649 = vmatpush3.bf16.msra.mxu1 %v3067_v30 }
 0x329   :  { %v1802_v42 = vmul.f32 1.442695, %v1772_v33  ;;  %v1773_v21 = vmin.f32 %v2703_v53, 0.0  ;;  %v2452_v40 = vadd.f32 -1.0, %v3131_v26  ;;  %v1830_v11 = vsel %vm1750_vm15, %v4297_v14, %v2451_v52  ;;  %2650 = vmatprep.subr.bf16.mxu1 %v3208_v61 }
 0x32a   :  { %v1798_v34 = vmul.f32 1.442695, %v1770_v12  ;;  %v1771_v24 = vmin.f32 %v2705_v57, 0.0  ;;  %v1833_v0 = vsel %vm1753_vm5, %v2695_v5, %v2454_v51  ;;  %vm1757_vm4 = vcmp.gt.f32.partialorder %v2703_v53, 0.0 }
 0x32b   :  { %3132 = vpow2.f32 %v1802_v42  ;;  %v1804_v28 = vmul.f32 1.442695, %v1773_v21  ;;  %v1843_v41 = vpack.c.bf16 %v1833_v0, %v1832_v37  ;;  %v1831_v10 = vsel %vm1751_vm1, %v2697_v7, %v2452_v40 }
 0x32c   :  { %3134 = vpow2.f32 %v1798_v34  ;;  %v1800_v17 = vmul.f32 1.442695, %v1771_v24  ;;  %v1842_v16 = vpack.c.bf16 %v1831_v10, %v1830_v11  ;;  %vm1754_vm6 = vcmp.gt.f32.partialorder %v2701_v23, 0.0  ;;  %2651 = vmatpush3.bf16.msra.mxu1 %v3068_v1 }
 0x32d   :  { %3136 = vpow2.f32 %v1804_v28  ;;  %vm1755_vm7 = vcmp.gt.f32.partialorder %v2705_v57, 0.0 }
 0x32e   :  { %3138 = vpow2.f32 %v1800_v17  ;;  %2636 = vmatprep.mubr.msk.bf16.mxu0 %vm572_vm8, %v1842_v16 }
 0x32f   :  { %2637 = vmatmul.mubr.msk.bf16.gmra.mrb[24].mxu0 %vm572_vm8, %v1843_v41 }
 0x335   :  { %v3133_v29 = vpop.eup %3132 }
 0x336   :  { %v3135_v56 = vpop.eup %3134  ;;  %v2457_v46 = vadd.f32 -1.0, %v3133_v29 }
 0x337   :  { %v3137_v58 = vpop.eup %3136  ;;  %v2455_v60 = vadd.f32 -1.0, %v3135_v56 }
 0x338   :  { %v3139_v63 = vpop.eup %3138  ;;  %v2458_v20 = vadd.f32 -1.0, %v3137_v58  ;;  %v1836_v44 = vsel %vm1756_vm3, %v2699_v18, %v2457_v46 }
 0x339   :  { %v2456_v39 = vadd.f32 -1.0, %v3139_v63  ;;  %v1834_v62 = vsel %vm1754_vm6, %v2701_v23, %v2455_v60 }
 0x33a   :  { %v1837_v9 = vsel %vm1757_vm4, %v2703_v53, %v2458_v20 }
 0x33b   :  { %v1845_v38 = vpack.c.bf16 %v1837_v9, %v1836_v44  ;;  %v1835_v14 = vsel %vm1755_vm7, %v2705_v57, %v2456_v39 }
 0x33c   :  { %v1844_v25 = vpack.c.bf16 %v1835_v14, %v1834_v62 }
 0x33e   :  { %2640 = vmatprep.mubr.msk.bf16.mxu0 %vm572_vm8, %v1844_v25 }
 0x33f   :  { %2641 = vmatmul.mubr.msk.bf16.gmra.mrb[28].mxu0 %vm572_vm8, %v1845_v38 }
 0x340   :  { %2670 = vmatprep.mubr.msk.bf16.mxu0 %vm3209_vm9, %v3208_v61 }
 0x3db   :  { %v2630_v4 = vpop.f32.mrb[16].mxu0 }
 0x3dc   :  { %v1936_v5 = vadd.f32 %v2630_v4, %v4351_v50  ;;  %v1927_v7 = vpop.f32.mrb[17].mxu0 }
 0x3dd   :  { %v1928_v22 = vadd.f32 %v4351_v50, %v1927_v7  ;;  %v2631_v55 = vpop.f32.mrb[18].mxu0 }
 0x3de   :  { %v2008_v8 = vmin.f32 %v1936_v5, 0.0  ;;  %v1939_v49 = vadd.f32 %v2631_v55, %v4351_v50  ;;  %v1930_v2 = vpop.f32.mrb[19].mxu0  ;;  %vm1992_vm10 = vcmp.gt.f32.partialorder %v1936_v5, 0.0 }
 0x3df   :  { %v2006_v54 = vmin.f32 %v1928_v22, 0.0  ;;  %v1931_v13 = vadd.f32 %v4351_v50, %v1930_v2  ;;  %vm1990_vm8 = vcmp.gt.f32.partialorder %v1928_v22, 0.0 }
 0x3e0   :  { %v2026_v48 = vmul.f32 1.442695, %v2008_v8  ;;  %v2009_v36 = vmin.f32 %v1939_v49, 0.0  ;;  %vm1993_vm12 = vcmp.gt.f32.partialorder %v1939_v49, 0.0 }
 0x3e1   :  { %v2022_v31 = vmul.f32 1.442695, %v2006_v54  ;;  %v2007_v59 = vmin.f32 %v1931_v13, 0.0  ;;  %vm1991_vm11 = vcmp.gt.f32.partialorder %v1931_v13, 0.0 }
 0x3e2   :  { %3140 = vpow2.f32 %v2026_v48  ;;  %v2028_v18 = vmul.f32 1.442695, %v2009_v36 }
 0x3e3   :  { %3142 = vpow2.f32 %v2022_v31  ;;  %v2024_v35 = vmul.f32 1.442695, %v2007_v59 }
 0x3e4   :  { %3144 = vpow2.f32 %v2028_v18 }
 0x3e5   :  { %3146 = vpow2.f32 %v2024_v35 }
 0x3ec   :  { %v3141_v15 = vpop.eup %3140 }
 0x3ed   :  { %v3143_v23 = vpop.eup %3142  ;;  %v2472_v33 = vadd.f32 -1.0, %v3141_v15 }
 0x3ee   :  { %v3145_v32 = vpop.eup %3144  ;;  %v2470_v53 = vadd.f32 -1.0, %v3143_v23 }
 0x3ef   :  { %v3147_v27 = vpop.eup %3146  ;;  %v2473_v12 = vadd.f32 -1.0, %v3145_v32  ;;  %v2072_v52 = vsel %vm1992_vm10, %v1936_v5, %v2472_v33 }
 0x3f0   :  { %v2070_v47 = vsel %vm1990_vm8, %v1928_v22, %v2470_v53  ;;  %v2471_v57 = vadd.f32 -1.0, %v3147_v27  ;;  %v2089_v41 = vsel %vm1532_vm2, %v2072_v52, 0.0 }
 0x3f1   :  { %v2086_v51 = vsel %vm1532_vm2, %v2070_v47, 0.0  ;;  %v2073_v28 = vsel %vm1993_vm12, %v1939_v49, %v2473_v12  ;;  %vm2285_vm12 = vcmask 818176  }
 0x3f2   :  { %v2634_v6 = vpop.f32.mrb[20].mxu0  ;;  %v2071_v42 = vsel %vm1991_vm11, %v1931_v13, %v2471_v57  ;;  %v2091_v58 = vsel %vm1532_vm2, %v2073_v28, 0.0  ;;  %vm2149_vm11 = vcmask 1041409  }
 0x3f3   :  { %v1952_v21 = vadd.f32 %v2634_v6, %v4351_v50  ;;  %v1943_v26 = vpop.f32.mrb[21].mxu0  ;;  %v2087_v34 = vsel %vm1532_vm2, %v2071_v42, 0.0 }
 0x3f4   :  { %v1944_v24 = vadd.f32 %v4351_v50, %v1943_v26  ;;  %v2635_v40 = vpop.f32.mrb[22].mxu0  ;;  %v2088_v37 = vadd.f32 %v2087_v34, %v2086_v51 }
 0x3f5   :  { %v2012_v0 = vmin.f32 %v1952_v21, 0.0  ;;  %v1955_v17 = vadd.f32 %v2635_v40, %v4351_v50  ;;  %v1946_v11 = vpop.f32.mrb[23].mxu0  ;;  %vm1996_vm14 = vcmp.gt.f32.partialorder %v1952_v21, 0.0 }
 0x3f6   :  { %v2010_v10 = vmin.f32 %v1944_v24, 0.0  ;;  %v1947_v16 = vadd.f32 %v4351_v50, %v1946_v11  ;;  %v2090_v29 = vadd.f32 %v2089_v41, %v2088_v37  ;;  %vm1994_vm13 = vcmp.gt.f32.partialorder %v1944_v24, 0.0 }
 0x3f7   :  { %v2034_v56 = vmul.f32 1.442695, %v2012_v0  ;;  %v2013_v46 = vmin.f32 %v1955_v17, 0.0  ;;  %vm1997_vm5 = vcmp.gt.f32.partialorder %v1955_v17, 0.0 }
 0x3f8   :  { %v2030_v60 = vmul.f32 1.442695, %v2010_v10  ;;  %v2011_v63 = vmin.f32 %v1947_v16, 0.0  ;;  %v2092_v20 = vadd.f32 %v2091_v58, %v2090_v29  ;;  %vm1995_vm15 = vcmp.gt.f32.partialorder %v1947_v16, 0.0 }
 0x3f9   :  { %3148 = vpow2.f32 %v2034_v56  ;;  %v2036_v39 = vmul.f32 1.442695, %v2013_v46 }
 0x3fa   :  { %3150 = vpow2.f32 %v2030_v60  ;;  %v2032_v44 = vmul.f32 1.442695, %v2011_v63 }
 0x3fb   :  { %3152 = vpow2.f32 %v2036_v39 }
 0x3fc   :  { %3154 = vpow2.f32 %v2032_v44 }
 0x402   :  { %v2638_v19 = vpop.f32.mrb[24].mxu0 }
 0x403   :  { %v3149_v9 = vpop.eup %3148  ;;  %v4366_v30 = vadd.f32 %v2638_v19, %v4351_v50  ;;  %v1959_v43 = vpop.f32.mrb[25].mxu0 }
 0x404   :  { %v3151_v62 = vpop.eup %3150  ;;  %v2476_v14 = vadd.f32 -1.0, %v3149_v9  ;;  %v1960_v5 = vadd.f32 %v4351_v50, %v1959_v43  ;;  %v2639_v7 = vpop.f32.mrb[26].mxu0 }
 0x405   :  { %v3153_v38 = vpop.eup %3152  ;;  %v2474_v25 = vadd.f32 -1.0, %v3151_v62  ;;  %v2016_v55 = vmin.f32 %v4366_v30, 0.0  ;;  %v1962_v8 = vpop.f32.mrb[27].mxu0  ;;  %v1971_v31 = vadd.f32 %v2639_v7, %v4351_v50  ;;  %vm2000_vm3 = vcmp.gt.f32.partialorder %v4366_v30, 0.0 }
 0x406   :  { %v3155_v45 = vpop.eup %3154  ;;  %v2477_v3 = vadd.f32 -1.0, %v3153_v38  ;;  %v2076_v49 = vsel %vm1996_vm14, %v1952_v21, %v2476_v14  ;;  %v2014_v36 = vmin.f32 %v1960_v5, 0.0  ;;  %v1963_v35 = vadd.f32 %v4351_v50, %v1962_v8 }
 0x407   :  { %v2074_v1 = vsel %vm1994_vm13, %v1944_v24, %v2474_v25  ;;  %v2475_v4 = vadd.f32 -1.0, %v3155_v45  ;;  %v2042_v48 = vmul.f32 1.442695, %v2016_v55  ;;  %v2097_v15 = vsel %vm1532_vm2, %v2076_v49, 0.0 }
 0x408   :  { %v2093_v22 = vsel %vm1532_vm2, %v2074_v1, 0.0  ;;  %v2077_v59 = vsel %vm1997_vm5, %v1955_v17, %v2477_v3  ;;  %v2038_v23 = vmul.f32 1.442695, %v2014_v36  ;;  %v2017_v32 = vmin.f32 %v1971_v31, 0.0 }
 0x409   :  { %v2094_v2 = vadd.f32 %v2093_v22, %v2092_v20  ;;  %v2075_v54 = vsel %vm1995_vm15, %v1947_v16, %v2475_v4  ;;  %3156 = vpow2.f32 %v2042_v48  ;;  %v2015_v53 = vmin.f32 %v1963_v35, 0.0 }
 0x40a   :  { %v2095_v13 = vsel %vm1532_vm2, %v2075_v54, 0.0  ;;  %v2099_v27 = vsel %vm1532_vm2, %v2077_v59, 0.0  ;;  %3158 = vpow2.f32 %v2038_v23  ;;  %v2044_v47 = vmul.f32 1.442695, %v2017_v32 }
 0x40b   :  { %v2096_v18 = vadd.f32 %v2095_v13, %v2094_v2  ;;  %v2040_v57 = vmul.f32 1.442695, %v2015_v53  ;;  %vm1998_vm1 = vcmp.gt.f32.partialorder %v1960_v5, 0.0  ;;  %vm1999_vm4 = vcmp.gt.f32.partialorder %v1963_v35, 0.0 }
 0x40c   :  { %3160 = vpow2.f32 %v2044_v47  ;;  %vm2001_vm6 = vcmp.gt.f32.partialorder %v1971_v31, 0.0  ;;  %vm2370_vm13 = vcmask 73728  }
 0x40d   :  { %v2098_v33 = vadd.f32 %v2097_v15, %v2096_v18  ;;  %3162 = vpow2.f32 %v2040_v57 }
 0x40f   :  { %v2100_v12 = vadd.f32 %v2099_v27, %v2098_v33 }
 0x411   :  { %v2101_v4 = vrot.slane %v2100_v12, 4 }
 0x412   :  { %v2642_v6 = vpop.f32.mrb[28].mxu0 }
 0x413   :  { %v1984_v52 = vadd.f32 %v2642_v6, %v4351_v50  ;;  %v1975_v42 = vpop.f32.mrb[29].mxu0  ;;  %v3157_v40 = vpop.eup %3156  ;;  %v2102_v2 = vadd.f32 %v2101_v4, %v2100_v12 }
 0x414   :  { %v1976_v21 = vadd.f32 %v4351_v50, %v1975_v42  ;;  %v2643_v26 = vpop.f32.mrb[30].mxu0  ;;  %v3159_v37 = vpop.eup %3158  ;;  %v2480_v29 = vadd.f32 -1.0, %v3157_v40 }
 0x415   :  { %v2020_v51 = vmin.f32 %v1984_v52, 0.0  ;;  %v1987_v34 = vadd.f32 %v2643_v26, %v4351_v50  ;;  %v1978_v24 = vpop.f32.mrb[31].mxu0  ;;  %v2478_v41 = vadd.f32 -1.0, %v3159_v37  ;;  %vm2004_vm9 = vcmp.gt.f32.partialorder %v1984_v52, 0.0  ;;  %v3071_v37 = vld [vmem:[%s4444_s13 + $0x10] sm:$0xff]  }
 0x416   :  { %v2018_v28 = vmin.f32 %v1976_v21, 0.0  ;;  %v1979_v11 = vadd.f32 %v4351_v50, %v1978_v24  ;;  %v3161_v16 = vpop.eup %3160  ;;  %v2080_v39 = vsel %vm2000_vm3, %v4366_v30, %v2480_v29  ;;  %vm2002_vm7 = vcmp.gt.f32.partialorder %v1976_v21, 0.0  ;;  %2661 = vmatpush3.bf16.msra.mxu0 %v3071_v37 }
 0x417   :  { %v2050_v0 = vmul.f32 1.442695, %v2020_v51  ;;  %v2021_v17 = vmin.f32 %v1987_v34, 0.0  ;;  %v3163_v46 = vpop.eup %3162  ;;  %v2078_v58 = vsel %vm1998_vm1, %v1960_v5, %v2478_v41  ;;  %v2481_v60 = vadd.f32 -1.0, %v3161_v16  ;;  %2662 = vmatprep.subr.bf16.mxu0 %v3208_v61  ;;  %v2486_v16 = vld [vmem:[%s4443_s12] ss:$0 sm:$0xff] }
 0x418   :  { %v2046_v10 = vmul.f32 1.442695, %v2018_v28  ;;  %v2479_v63 = vadd.f32 -1.0, %v3163_v46  ;;  %v2019_v20 = vmin.f32 %v1979_v11, 0.0  ;;  %v2107_v9 = vsel %vm1532_vm2, %v2078_v58, 0.0  ;;  %s3211_s12 = smov [#allocation2]  }
 0x419   :  { %3164 = vpow2.f32 %v2050_v0  ;;  %v2052_v56 = vmul.f32 1.442695, %v2021_v17  ;;  %v2081_v38 = vsel %vm2001_vm6, %v1971_v31, %v2481_v60  ;;  %v2110_v25 = vsel %vm1532_vm2, %v2080_v39, 0.0  ;;  %v3072_v0 = vld [vmem:[%s4444_s13 + $0x18] sm:$0xff]   ;;  %v3073_v17 = vld [vmem:[%s4444_s13 + $0x20] sm:$0xff]  }
 0x41a   :  { %3166 = vpow2.f32 %v2046_v10  ;;  %v2079_v44 = vsel %vm1999_vm4, %v1963_v35, %v2479_v63  ;;  %v2048_v50 = vmul.f32 1.442695, %v2019_v20  ;;  %v2112_v45 = vsel %vm1532_vm2, %v2081_v38, 0.0  ;;  %2663 = vmatpush3.bf16.msra.mxu0 %v3072_v0  ;;  %v3075_v41 = vld [vmem:[%s4444_s13 + $0x30] ss:$0 sps:$4 sm:$0x33]  }
 0x41b   :  { %3168 = vpow2.f32 %v2052_v56  ;;  %v2108_v62 = vsel %vm1532_vm2, %v2079_v44, 0.0  ;;  %vm2003_vm8 = vcmp.gt.f32.partialorder %v1979_v11, 0.0  ;;  %vm2005_vm10 = vcmp.gt.f32.partialorder %v1987_v34, 0.0  ;;  %2664 = vmatprep.subr.bf16.mxu0 %v3208_v61 }
 0x41c   :  { %v2109_v14 = vadd.f32 %v2108_v62, %v2107_v9  ;;  %3170 = vpow2.f32 %v2048_v50  ;;  %v2103_v59 = vrot.slane %v2102_v2, 2  ;;  %v2290_v10 = vsel %vm84_vm0, %v3075_v41, 0  ;;  %v2493_v9 = vld [vmem:[%s4445_s14] ss:$0 sm:$0xff]  ;;  %s2378_s14 = sshll.u32 %s3211_s12, 4  ;;  %s2379_s14 = int_to_ptr.vmem [resolvable:$true] %s2378_s14 }
 0x41d   :  { %vm2332_vm0 = vcmask 74752   ;;  %s3178_s8 = scalar_lea.vmem %s2379_s14, 32  ;;  %p3183_p1 = scmp.lt.s32.totalorder %s2379_s14, %s2379_s14 }
 0x41e   :  { %v2111_v19 = vadd.f32 %v2110_v25, %v2109_v14  ;;  %v2104_v33 = vadd.f32 %v2103_v59, %v2102_v2  ;;  %2665 = vmatpush3.bf16.msra.mxu0 %v3073_v17  ;;  %p3179_p0 = scmp.ne.s32.totalorder %s2379_s14, %s3178_s8  ;;  %p3184_p2 = scmp.lt.s32.totalorder %s3178_s8, %s3178_s8 }
 0x41f   :  { %2666 = vmatprep.subr.bf16.mxu0 %v3208_v61 }
 0x420   :  { %v2113_v1 = vadd.f32 %v2112_v45, %v2111_v19  ;;  %v2105_v47 = vrot.slane %v2104_v33, 1  ;;  %p3185_p3 = por %p3184_p2, %p3183_p1 }
 0x422   :  { %v2106_v6 = vadd.f32 %v2105_v47, %v2104_v33  ;;  %p3186_p4 = pnand %p3185_p3, %p3179_p0 }
 0x423   :  { %v3165_v43 = vpop.eup %3164 }
 0x424   :  { %v3167_v3 = vpop.eup %3166  ;;  %v2484_v22 = vadd.f32 -1.0, %v3165_v43 }
 0x425   :  { %v2482_v30 = vadd.f32 -1.0, %v3167_v3  ;;  %v3169_v5 = vpop.eup %3168 }
 0x426   :  { %v3171_v8 = vpop.eup %3170  ;;  %v2485_v54 = vadd.f32 -1.0, %v3169_v5  ;;  %v2084_v48 = vsel %vm2004_vm9, %v1984_v52, %v2484_v22 }
 0x427   :  { %v2082_v7 = vsel %vm2002_vm7, %v1976_v21, %v2482_v30  ;;  %v2483_v13 = vadd.f32 -1.0, %v3171_v8  ;;  %v2118_v15 = vsel %vm1532_vm2, %v2084_v48, 0.0  ;;  %v2128_v21 = vpack.c.bf16 %v2106_v6, %v2106_v6 }
 0x428   :  { %v2114_v55 = vsel %vm1532_vm2, %v2082_v7, 0.0  ;;  %v2085_v18 = vsel %vm2005_vm10, %v1987_v34, %v2485_v54  ;;  %v3210_v7 = vmov 1966171168  }
 0x429   :  { %v2115_v49 = vadd.f32 %v2114_v55, %v2113_v1  ;;  %v2083_v36 = vsel %vm2003_vm8, %v1979_v11, %v2483_v13  ;;  %v2120_v32 = vsel %vm1532_vm2, %v2085_v18, 0.0  ;;  %v2147_v34 = vunpack.c.l.b16 %v2128_v21  ;;  %v3074_v11 = vld [vmem:[%s4444_s13 + $0x28] sm:$0xff]  }
 0x42a   :  { %v2116_v31 = vsel %vm1532_vm2, %v2083_v36, 0.0  ;;  %2667 = vmatpush3.bf16.msra.mxu0 %v3074_v11  ;;  %v2347_v22 = vunpack.c.l.s4 %v3210_v7  ;;  %v2349_v55 = vlaneseq }
 0x42b   :  { %v2117_v35 = vadd.f32 %v2116_v31, %v2115_v49  ;;  %2668 = vmatprep.subr.bf16.mxu0 %v3208_v61 }
 0x42c   :  { %v2348_v8 = vunpack.c.0.s8 %v2347_v22  ;;  %v2350_v49 = vshrl.u32 %v2349_v55, 7 }
 0x42d   :  { %v2119_v23 = vadd.f32 %v2118_v15, %v2117_v35 }
 0x42e   :  { %2669 = vmatpush3.bf16.msra.mxu0 %v2290_v10  ;;  %v2351_v54 = vsub.s32 %v2348_v8, %v2350_v49 }
 0x42f   :  { %v2121_v53 = vadd.f32 %v2120_v32, %v2119_v23 }
 0x431   :  { %v2122_v27 = vrot.slane %v2121_v53, 4 }
 0x433   :  { %v2123_v12 = vadd.f32 %v2122_v27, %v2121_v53 }
 0x435   :  { %v2124_v57 = vrot.slane %v2123_v12, 2 }
 0x437   :  { %v2125_v52 = vadd.f32 %v2124_v57, %v2123_v12 }
 0x439   :  { %v2126_v42 = vrot.slane %v2125_v52, 1 }
 0x43b   :  { %v2127_v26 = vadd.f32 %v2126_v42, %v2125_v52 }
 0x43d   :  { %v2129_v51 = vpack.c.bf16 %v2127_v26, %v2127_v26 }
 0x43f   :  { %v2148_v24 = vunpack.c.l.b16 %v2129_v51 }
 0x441   :  { %v2150_v40 = vsel %vm2149_vm11, %v2148_v24, %v2147_v34 }
 0x442   :  { %v2151_v28 = vpack.c.b16 %v2150_v40, %v2150_v40 }
 0x444   :  { %2653 = vmatmul.mubr.msk.bf16.vlgmr.msra.gmra.mrb[16].mxu1 %vm1532_vm2, %v2151_v28 }
 0x517   :  { %v2213_v29 = vpop.f32.mrb[16].mxu1 }
 0x518   :  { %v2214_v56 = vadd.f32 %v2486_v16, %v2213_v29  ;;  %v2654_v46 = vpop.f32.mrb[17].mxu1 }
 0x519   :  { %v2216_v58 = vpop.f32.mrb[18].mxu1 }
 0x51a   :  { %v2220_v60 = vmin.f32 %v2214_v56, 0.0  ;;  %v2655_v63 = vpop.f32.mrb[19].mxu1  ;;  %vm2219_vm2 = vcmp.gt.f32.partialorder %v2214_v56, 0.0 }
 0x51c   :  { %v2221_v20 = vmul.f32 1.442695, %v2220_v60 }
 0x51e   :  { %3172 = vpow2.f32 %v2221_v20 }
 0x528   :  { %v3173_v39 = vpop.eup %3172 }
 0x529   :  { %v2492_v44 = vadd.f32 -1.0, %v3173_v39 }
 0x52b   :  { %v2224_v50 = vsel %vm2219_vm2, %v2214_v56, %v2492_v44 }
 0x52c   :  { %v2225_v61 = vpack.c.bf16 %v2224_v50, %v2224_v50 }
 0x52e   :  { %2671 = vmatmul.mubr.msk.bf16.vlgmr.msra.gmra.mrb[32].mxu0 %vm2285_vm12, %v2225_v61 }
 0x601   :  { %v2326_v62 = vpop.f32.mrb[32].mxu0 }
 0x602   :  { %v2327_v38 = vadd.f32 %v2493_v9, %v2326_v62  ;;  %v2672_v14 = vpop.f32.mrb[33].mxu0 }
 0x603   :  { %v2329_v25 = vpop.f32.mrb[34].mxu0 }
 0x604   :  { %v2673_v19 = vpop.f32.mrb[35].mxu0  ;;  %v2333_v45 = vsel %vm2332_vm0, %v2327_v38, -inf }
 0x605   :  { %2334 = vmax.xlane.f32.xlu0 %v2333_v45 }
 0x692   :  { %v2335_v43 = vpop.xlane.xlu0 %2334 }
 0x693   :  { %v2336_v1 = vsub.f32 %v2327_v38, %v2335_v43 }
 0x695   :  { %v2337_v3 = vmul.f32 1.442695, %v2336_v1 }
 0x697   :  { %3174 = vpow2.f32 %v2337_v3 }
 0x6a1   :  { %v3175_v30 = vpop.eup %3174 }
 0x6a2   :  { %v2339_v4 = vsel %vm2332_vm0, %v3175_v30, 0.0 }
 0x6a3   :  { %2340 = vadd.xlane.f32.xlu1 %v2339_v4 }
 0x730   :  { %v2341_v5 = vpop.xlane.xlu1 %2340 }
 0x731   :  { %3176 = vlog2.f32 %v2341_v5 }
 0x73b   :  { %v3177_v2 = vpop.eup %3176 }
 0x73c   :  { %v2343_v13 = vmul.f32 0.6931472, %v3177_v2 }
 0x73e   :  { %v2344_v48 = vsub.f32 %v2336_v1, %v2343_v13 }
 0x740   :  { %v2352_v36 = vrot.slane %v2344_v48, %v2351_v54 }
 0x742   :  { %v2353_v31 = vcombine.high %v2352_v36, %v2352_v36  ;;  %v2360_v59 = vrot.slane %v2352_v36, %v2351_v54 }
 0x744   :  { %v2367_v18 = vrot.slane %v2353_v31, %v2351_v54  ;;  %2371 = vst.msk [vmem:[#allocation2] sm:$0x1] %vm2370_vm13, %v2360_v59 }
 0x746   :  { %2372 = vst.msk [vmem:[#allocation2 + $0x1] sm:$0x1] %vm2370_vm13, %v2367_v18 }
 0x747   :  { %3189 = shalt.err (!%p3186_p4)
}
 0x748   :  { %s3190_s22 = scalar_lea.hbm %s4446_s15, 32 }
 0x749   :  { %p3191_p5 = scmp.ne.s32.totalorder %s4446_s15, %s3190_s22  ;;  %p3194_p6 = scmp.lt.u32.totalorder %s3190_s22, %s4446_s15 }
 0x74b   :  { %p3196_p7 = pnand %p3194_p6, %p3191_p5 }
 0x74d   :  { %3199 = shalt.err (!%p3196_p7)
}
 0x74e   :  { %s3212_s24 = smov 1  }
 0x74f   :  { %2384 = dma.vmem_to_hbm [thread:$0]  %s2379_s14, 32, %s4446_s15, [#allocation3], %s3202_s17, %s3202_s17, %s3212_s24  }
 0x750   :  { %3200 = dma.done.wait [#allocation3], 32  }
 0x751   :  { %3201 = vsyncadd [#allocation3], 4294967264 }
 0x752   :  { %2388 = vsyncpa [#allocation3], 1 }

</bundles_post_ra>
